<compile_context>
chip_gen: v5e
topology: v5e:2x2
jax: 0.10.0
libtpu: 0.0.40
codegen_flags: <defaults>
</compile_context>

<pallas_src>
import math
from functools import partial

import jax
import jax.numpy as jnp
from jax import lax
from jax.experimental import pallas as pl
from jax.experimental.pallas import tpu as pltpu

MAX_PERIOD = 10000.0


# ------------------------------ fused kernel --------------------------------

def _fused_kernel(crop_ref,    # SMEM (1,) int32   (scalar prefetch: crop_start_ind[0])
                  fr_ref,      # [TM, F]    raw frame features (bf16)
                  names_ref,   # [BJ, T5]   text features (bf16, resident)
                  wstk_ref,    # [F, 4L]    frame weights stacked along OUTPUT axis (bf16)
                  wtxt_ref,    # [T5, L]    text weights (bf16)
                  bias_ref,    # [4, L]     per-group biases, b_text folded in (f32)
                  tab_ref,     # [2, L]     row 0: inv_freq, row 1: phase shift (0 / -pi/2)
                  o_ref,       # [TM, L]
                  *, bj, n_joints, n_tpos, latent, s_per_tile):
    tm = o_ref.shape[0]
    L = latent

    # (1) all four frame projections in one MXU pass: [TM,F]bf16 @ [F,4L]bf16 -> f32.
    proj4 = jnp.dot(fr_ref[...], wstk_ref[...], preferred_element_type=jnp.float32)

    # (2) per-row structure in-register.  Global row r = s*BJ + b*J + j; the tile
    #     start (i*TM) is a multiple of BJ, so within-tile offsets fully determine
    #     the (bj, j) pattern.  floor((o+0.5)/k) == o//k exactly for small ints,
    #     avoiding vector integer division.
    o = lax.broadcasted_iota(jnp.int32, (tm, 1), 0).astype(jnp.float32)
    s_local = jnp.floor((o + 0.5) * (1.0 / bj))                      # o // BJ
    bj_idx = o - s_local * bj                                        # o %  BJ
    blk = jnp.floor((bj_idx + 0.5) * (1.0 / n_joints))
    is_root = (bj_idx - blk * n_joints < 0.5).astype(jnp.float32)    # (o % J) == 0
    s = s_local + (pl.program_id(0) * s_per_tile).astype(jnp.float32)
    is_tpos = (s < n_tpos).astype(jnp.float32)

    # (3) pick each row's group slice; stacked biases already include b_text.
    m_tr = is_tpos * is_root
    m_tj = is_tpos * (1.0 - is_root)
    m_mr = (1.0 - is_tpos) * is_root
    m_mj = (1.0 - is_tpos) * (1.0 - is_root)
    frame = (m_tr * (proj4[:, 0 * L:1 * L] + bias_ref[0:1, :])
             + m_tj * (proj4[:, 1 * L:2 * L] + bias_ref[1:2, :])
             + m_mr * (proj4[:, 2 * L:3 * L] + bias_ref[2:3, :])
             + m_mj * (proj4[:, 3 * L:4 * L] + bias_ref[3:4, :]))

    # (4) text projection once per tile at [BJ, L]; map onto rows with a one-hot
    #     selector matmul (exact 0/1 values, f32 MXU pass with K = BJ).
    text_bj = jnp.dot(names_ref[...], wtxt_ref[...],
                      preferred_element_type=jnp.float32)            # [BJ, L]
    cols = lax.broadcasted_iota(jnp.int32, (tm, bj), 1).astype(jnp.float32)
    sel = (jnp.abs(cols - bj_idx) < 0.5).astype(jnp.float32)         # [TM, BJ]
    text = jnp.dot(sel, text_bj, preferred_element_type=jnp.float32)  # [TM, L]

    # (5) sinusoidal positional embedding; pos = s (+crop for frames >= 1),
    #     cos(x - pi/2) == sin(x) so one fused FMA + cos covers both halves.
    crop = crop_ref[0].astype(jnp.float32)
    pos = jnp.where(s >= 1.0, s + crop, s)                           # [TM, 1]
    pos_emb = jnp.cos(pos * tab_ref[0:1, :] + tab_ref[1:2, :])       # [TM, L]

    o_ref[...] = (frame + text + pos_emb).astype(o_ref.dtype)


def _lcm(a, b):
    return a * b // math.gcd(a, b)


# ------------------------------ forward (glue) -------------------------------

def input_process_forward(params, x, tpos_first_frame, joints_embedded_names,
                          crop_start_ind, *, compute_dtype=jnp.bfloat16,
                          out_dtype=jnp.float32, target_rows=1024):
    B, J, F, T = x.shape
    A = tpos_first_frame.shape[0]
    S = A + T
    L = params["w_joint"].shape[1]
    T5 = params["w_text"].shape[0]
    BJ = B * J
    M = S * BJ
    half = L // 2

    # ---- input prep: one transpose/concat pass, cast once to bf16 ----
    xp = jnp.transpose(x, (3, 0, 1, 2))                               # [T,B,J,F]
    frames = jnp.concatenate([tpos_first_frame, xp], axis=0)          # [S,B,J,F]
    frames2d = frames.reshape(M, F).astype(compute_dtype)             # [M, F]
    names2d = joints_embedded_names.reshape(BJ, T5).astype(compute_dtype)

    # ---- parameter prep (would normally be folded once at init time) ----
    w_stack = jnp.concatenate(
        [params["w_tpos_root"], params["w_tpos_joint"],
         params["w_root"], params["w_joint"]], axis=1).astype(compute_dtype)   # [F, 4L]
    w_text = params["w_text"].astype(compute_dtype)                            # [T5, L]
    bias_stack = (jnp.stack([params["b_tpos_root"], params["b_tpos_joint"],
                             params["b_root"], params["b_joint"]], axis=0)
                  + params["b_text"][None, :]).astype(jnp.float32)             # [4, L]

    adim = jnp.arange(half, dtype=jnp.float32)
    inv_freq_h = 1.0 / (MAX_PERIOD ** (adim / (half - 1)))
    sin_tab = jnp.stack(
        [jnp.concatenate([inv_freq_h, inv_freq_h]),
         jnp.concatenate([jnp.zeros((half,), jnp.float32),
                          jnp.full((half,), -jnp.pi / 2, jnp.float32)])],
        axis=0)                                                                 # [2, L]

    # TODO(synk): nn.Dropout(p=0.1) is treated as eval-mode identity.
    crop0 = crop_start_ind[:1].astype(jnp.int32)       # torch path uses batch 0 only

    # ---- row tiling: TM multiple of lcm(8, BJ) so the within-tile (s, j) pattern
    #      is tile-invariant; no input padding, trailing block is ragged (Pallas
    #      masks its out-of-range writes).
    unit = _lcm(8, BJ)
    budget = max(unit, (4 * 1024 * 1024) // max(1, 16 * L))   # keep [TM,4L] f32 modest
    tm = max(unit, (min(target_rows, budget, M) // unit) * unit)
    grid_m = pl.cdiv(M, tm)

    kernel = partial(_fused_kernel, bj=BJ, n_joints=J, n_tpos=A, latent=L,
                     s_per_tile=tm // BJ)

    def row_spec(w):
        return pl.BlockSpec((tm, w), lambda i, c: (i, 0))

    def full_spec(r, w):
        return pl.BlockSpec((r, w), lambda i, c: (0, 0))

    out2d = pl.pallas_call(
        kernel,
        out_shape=jax.ShapeDtypeStruct((M, L), out_dtype),
        grid_spec=pltpu.PrefetchScalarGridSpec(
            num_scalar_prefetch=1,
            grid=(grid_m,),
            in_specs=[
                row_spec(F),             # frames (raw, bf16)
                full_spec(BJ, T5),       # joints_embedded_names (resident)
                full_spec(F, 4 * L),     # stacked frame weights
                full_spec(T5, L),        # text weights
                full_spec(4, L),         # stacked biases (+ b_text folded in)
                full_spec(2, L),         # sinusoid table (inv_freq / phase shift)
            ],
            out_specs=row_spec(L),
        ),
        # NOTE(v7x): if plain "parallel" does not megacore-split a 1-D grid, switch
        # to pltpu.CORE_PARALLEL.  The invariant full_spec inputs could also take
        # pipeline_mode=pl.Buffered(1) for a small VMEM saving.
        compiler_params=pltpu.CompilerParams(
            dimension_semantics=("parallel",)),
    )(crop0, frames2d, names2d, w_stack, w_text, bias_stack, sin_tab)

    return out2d.reshape(S, B, J, L)


# --------------------------- pure-JAX reference -----------------------------

def reference_forward(params, x, tpos_first_frame, joints_embedded_names,
                      crop_start_ind, quant_dtype=None):
    # quant_dtype mimics the kernel's bf16 input casts (f32 math on quantized inputs).
    if quant_dtype is None:
        q = lambda a: a
    else:
        q = lambda a: a.astype(quant_dtype).astype(jnp.float32)
    lin = lambda a, w, b: q(a) @ q(w) + b
    xp = jnp.transpose(x, (3, 0, 1, 2))
    tpos_j = lin(tpos_first_frame[:, :, 1:], params["w_tpos_joint"], params["b_tpos_joint"])
    tpos_r = lin(tpos_first_frame[:, :, 0:1], params["w_tpos_root"], params["b_tpos_root"])
    x_j = lin(xp[:, :, 1:], params["w_joint"], params["b_joint"])
    x_r = lin(xp[:, :, 0:1], params["w_root"], params["b_root"])
    x_cat = jnp.concatenate([jnp.concatenate([tpos_r, tpos_j], axis=2),
                             jnp.concatenate([x_r, x_j], axis=2)], axis=0)
    text = lin(joints_embedded_names, params["w_text"], params["b_text"])
    x_cat = x_cat + text[None, ...]
    S, L = x_cat.shape[0], x_cat.shape[-1]
    half = L // 2
    pos = jnp.arange(S, dtype=jnp.float32)
    pos = pos.at[1:].add(crop_start_ind[0].astype(jnp.float32)).reshape(S, 1)
    adim = jnp.arange(half, dtype=jnp.float32)[None, :]
    phase = pos / (MAX_PERIOD ** (adim / (half - 1)))
    pos_emb = jnp.concatenate([jnp.cos(phase), jnp.sin(phase)], axis=-1)      # [S, L]
    return x_cat + pos_emb[:, None, None, :]


# ------------------------------- params init --------------------------------

def init_params(key, input_feats, root_input_feats, latent_dim, t5_dim):
    ks = jax.random.split(key, 10)
    w = lambda k, i, o: jax.random.normal(k, (i, o), jnp.float32) * 0.02
    b = lambda k, o: jax.random.normal(k, (o,), jnp.float32) * 0.02
    return dict(
        w_root=w(ks[0], root_input_feats, latent_dim), b_root=b(ks[1], latent_dim),
        w_tpos_root=w(ks[2], root_input_feats, latent_dim), b_tpos_root=b(ks[3], latent_dim),
        w_joint=w(ks[4], input_feats, latent_dim), b_joint=b(ks[5], latent_dim),
        w_tpos_joint=w(ks[6], input_feats, latent_dim), b_tpos_joint=b(ks[7], latent_dim),
        w_text=w(ks[8], t5_dim, latent_dim), b_text=b(ks[9], latent_dim),
    )


if __name__ == "__main__":
    key = jax.random.PRNGKey(0)
    B, J, F, T = 2, 5, 16, 6          # batch, joints (1 root + 4), feats, frames
    L, T5, A = 128, 32, 1             # latent_dim, t5_output_dim, #tpos frames
    kx, kt, kn, kc, kp = jax.random.split(key, 5)

    x = jax.random.normal(kx, (B, J, F, T), jnp.float32)
    tpos_first_frame = jax.random.normal(kt, (A, B, J, F), jnp.float32)
    joints_embedded_names = jax.random.normal(kn, (B, J, T5), jnp.float32)
    crop_start_ind = jax.random.randint(kc, (B,), 0, 20, jnp.int32)

    params = init_params(kp, input_feats=F, root_input_feats=F,
                         latent_dim=L, t5_dim=T5)

    fwd = jax.jit(input_process_forward)
    out = jax.block_until_ready(
        fwd(params, x, tpos_first_frame, joints_embedded_names, crop_start_ind))

    # Strict check vs. a reference using the same bf16 input quantization.
    ref_q = reference_forward(params, x, tpos_first_frame, joints_embedded_names,
                              crop_start_ind, quant_dtype=jnp.bfloat16)
    # Loose sanity check vs. the pure-f32 module semantics.
    ref_f = reference_forward(params, x, tpos_first_frame, joints_embedded_names,
                              crop_start_ind)

    assert out.shape == (A + T, B, J, L), out.shape
    assert jnp.allclose(out, ref_q, atol=1e-4, rtol=1e-4), \
        float(jnp.max(jnp.abs(out - ref_q)))
    assert jnp.allclose(out, ref_f, atol=2e-2, rtol=2e-2), \
        float(jnp.max(jnp.abs(out - ref_f)))
    print("KERNEL_OK")
</pallas_src>

<mosaic_0001>
module attributes {stable_mosaic.version = 11 : i64} {
  func.func @_fused_kernel(%arg0: i32, %arg1: memref<1xi32, #tpu.memory_space<smem>>, %arg2: memref<40x16xbf16, #tpu.memory_space<vmem>>, %arg3: memref<10x32xbf16, #tpu.memory_space<vmem>>, %arg4: memref<16x512xbf16, #tpu.memory_space<vmem>>, %arg5: memref<32x128xbf16, #tpu.memory_space<vmem>>, %arg6: memref<4x128xf32, #tpu.memory_space<vmem>>, %arg7: memref<2x128xf32, #tpu.memory_space<vmem>>, %arg8: memref<40x128xf32, #tpu.memory_space<vmem>>) attributes {dimension_semantics = [#tpu.dimension_semantics<parallel>], iteration_bounds = array<i64: 2>, scalar_prefetch = 1 : i64, scratch_operands = 0 : i64, tpu.core_type = #tpu.core_type<tc>, window_params = [{transform_indices = @transform_0, window_bounds = array<i64: 40, 16>}, {pipeline_mode = #tpu.pipeline_mode<synchronous>, transform_indices = @transform_1, window_bounds = array<i64: 10, 32>}, {pipeline_mode = #tpu.pipeline_mode<synchronous>, transform_indices = @transform_2, window_bounds = array<i64: 16, 512>}, {pipeline_mode = #tpu.pipeline_mode<synchronous>, transform_indices = @transform_3, window_bounds = array<i64: 32, 128>}, {pipeline_mode = #tpu.pipeline_mode<synchronous>, transform_indices = @transform_4, window_bounds = array<i64: 4, 128>}, {pipeline_mode = #tpu.pipeline_mode<synchronous>, transform_indices = @transform_5, window_bounds = array<i64: 2, 128>}, {transform_indices = @transform_6, window_bounds = array<i64: 40, 128>}]} {
    %c0 = arith.constant 0 : index
    %c0_0 = arith.constant 0 : index
    %0 = vector.load %arg2[%c0, %c0_0] : memref<40x16xbf16, #tpu.memory_space<vmem>>, vector<40x16xbf16>
    %c0_1 = arith.constant 0 : index
    %c0_2 = arith.constant 0 : index
    %1 = vector.load %arg4[%c0_1, %c0_2] : memref<16x512xbf16, #tpu.memory_space<vmem>>, vector<16x512xbf16>
    %cst = arith.constant dense<0.000000e+00> : vector<40x512xf32>
    %2 = tpu.matmul %0, %1, %cst {dimension_numbers = #tpu.dot_dimension_numbers<[1], [0], [0], [1], [0, 0, 1, 1], [], []>} : vector<40x16xbf16>, vector<16x512xbf16>, vector<40x512xf32> -> vector<40x512xf32>
    %3 = tpu.iota {dimensions = array<i32: 0>} : vector<40x1xi32>
    %4 = arith.sitofp %3 : vector<40x1xi32> to vector<40x1xf32>
    %cst_3 = arith.constant 5.000000e-01 : f32
    %5 = vector.broadcast %cst_3 : f32 to vector<40x1xf32>
    %6 = arith.addf %4, %5 : vector<40x1xf32>
    %cst_4 = arith.constant 1.000000e-01 : f32
    %7 = vector.broadcast %cst_4 : f32 to vector<40x1xf32>
    %8 = arith.mulf %6, %7 : vector<40x1xf32>
    %9 = math.floor %8 : vector<40x1xf32>
    %cst_5 = arith.constant 1.000000e+01 : f32
    %10 = vector.broadcast %cst_5 : f32 to vector<40x1xf32>
    %11 = arith.mulf %9, %10 : vector<40x1xf32>
    %12 = arith.subf %4, %11 : vector<40x1xf32>
    %cst_6 = arith.constant 5.000000e-01 : f32
    %13 = vector.broadcast %cst_6 : f32 to vector<40x1xf32>
    %14 = arith.addf %12, %13 : vector<40x1xf32>
    %cst_7 = arith.constant 2.000000e-01 : f32
    %15 = vector.broadcast %cst_7 : f32 to vector<40x1xf32>
    %16 = arith.mulf %14, %15 : vector<40x1xf32>
    %17 = math.floor %16 : vector<40x1xf32>
    %cst_8 = arith.constant 5.000000e+00 : f32
    %18 = vector.broadcast %cst_8 : f32 to vector<40x1xf32>
    %19 = arith.mulf %17, %18 : vector<40x1xf32>
    %20 = arith.subf %12, %19 : vector<40x1xf32>
    %cst_9 = arith.constant 5.000000e-01 : f32
    %21 = vector.broadcast %cst_9 : f32 to vector<40x1xf32>
    %22 = arith.cmpf olt, %20, %21 : vector<40x1xf32>
    %23 = arith.extui %22 : vector<40x1xi1> to vector<40x1xi32>
    %24 = arith.sitofp %23 : vector<40x1xi32> to vector<40x1xf32>
    %c4_i32 = arith.constant 4 : i32
    %25 = arith.muli %arg0, %c4_i32 : i32
    %26 = arith.sitofp %25 : i32 to f32
    %27 = vector.broadcast %26 : f32 to vector<40x1xf32>
    %28 = arith.addf %9, %27 : vector<40x1xf32>
    %cst_10 = arith.constant 1.000000e+00 : f32
    %29 = vector.broadcast %cst_10 : f32 to vector<40x1xf32>
    %30 = arith.cmpf olt, %28, %29 : vector<40x1xf32>
    %31 = arith.extui %30 : vector<40x1xi1> to vector<40x1xi32>
    %32 = arith.sitofp %31 : vector<40x1xi32> to vector<40x1xf32>
    %33 = arith.mulf %32, %24 : vector<40x1xf32>
    %cst_11 = arith.constant 1.000000e+00 : f32
    %34 = vector.broadcast %cst_11 : f32 to vector<40x1xf32>
    %35 = arith.subf %34, %24 : vector<40x1xf32>
    %36 = arith.mulf %32, %35 : vector<40x1xf32>
    %cst_12 = arith.constant 1.000000e+00 : f32
    %37 = vector.broadcast %cst_12 : f32 to vector<40x1xf32>
    %38 = arith.subf %37, %32 : vector<40x1xf32>
    %39 = arith.mulf %38, %24 : vector<40x1xf32>
    %cst_13 = arith.constant 1.000000e+00 : f32
    %40 = vector.broadcast %cst_13 : f32 to vector<40x1xf32>
    %41 = arith.subf %40, %32 : vector<40x1xf32>
    %cst_14 = arith.constant 1.000000e+00 : f32
    %42 = vector.broadcast %cst_14 : f32 to vector<40x1xf32>
    %43 = arith.subf %42, %24 : vector<40x1xf32>
    %44 = arith.mulf %41, %43 : vector<40x1xf32>
    %45 = vector.extract_strided_slice %2 {offsets = [0, 0], sizes = [40, 128], strides = [1, 1]} : vector<40x512xf32> to vector<40x128xf32>
    %c0_15 = arith.constant 0 : index
    %c0_16 = arith.constant 0 : index
    %46 = vector.load %arg6[%c0_15, %c0_16] : memref<4x128xf32, #tpu.memory_space<vmem>>, vector<1x128xf32>
    %47 = vector.broadcast %46 : vector<1x128xf32> to vector<40x128xf32>
    %48 = arith.addf %45, %47 : vector<40x128xf32>
    %49 = vector.broadcast %33 : vector<40x1xf32> to vector<40x128xf32>
    %50 = arith.mulf %49, %48 : vector<40x128xf32>
    %51 = vector.extract_strided_slice %2 {offsets = [0, 128], sizes = [40, 128], strides = [1, 1]} : vector<40x512xf32> to vector<40x128xf32>
    %c1 = arith.constant 1 : index
    %c0_17 = arith.constant 0 : index
    %52 = vector.load %arg6[%c1, %c0_17] : memref<4x128xf32, #tpu.memory_space<vmem>>, vector<1x128xf32>
    %53 = vector.broadcast %52 : vector<1x128xf32> to vector<40x128xf32>
    %54 = arith.addf %51, %53 : vector<40x128xf32>
    %55 = vector.broadcast %36 : vector<40x1xf32> to vector<40x128xf32>
    %56 = arith.mulf %55, %54 : vector<40x128xf32>
    %57 = arith.addf %50, %56 : vector<40x128xf32>
    %58 = vector.extract_strided_slice %2 {offsets = [0, 256], sizes = [40, 128], strides = [1, 1]} : vector<40x512xf32> to vector<40x128xf32>
    %c2 = arith.constant 2 : index
    %c0_18 = arith.constant 0 : index
    %59 = vector.load %arg6[%c2, %c0_18] : memref<4x128xf32, #tpu.memory_space<vmem>>, vector<1x128xf32>
    %60 = vector.broadcast %59 : vector<1x128xf32> to vector<40x128xf32>
    %61 = arith.addf %58, %60 : vector<40x128xf32>
    %62 = vector.broadcast %39 : vector<40x1xf32> to vector<40x128xf32>
    %63 = arith.mulf %62, %61 : vector<40x128xf32>
    %64 = arith.addf %57, %63 : vector<40x128xf32>
    %65 = vector.extract_strided_slice %2 {offsets = [0, 384], sizes = [40, 128], strides = [1, 1]} : vector<40x512xf32> to vector<40x128xf32>
    %c3 = arith.constant 3 : index
    %c0_19 = arith.constant 0 : index
    %66 = vector.load %arg6[%c3, %c0_19] : memref<4x128xf32, #tpu.memory_space<vmem>>, vector<1x128xf32>
    %67 = vector.broadcast %66 : vector<1x128xf32> to vector<40x128xf32>
    %68 = arith.addf %65, %67 : vector<40x128xf32>
    %69 = vector.broadcast %44 : vector<40x1xf32> to vector<40x128xf32>
    %70 = arith.mulf %69, %68 : vector<40x128xf32>
    %71 = arith.addf %64, %70 : vector<40x128xf32>
    %c0_20 = arith.constant 0 : index
    %c0_21 = arith.constant 0 : index
    %72 = vector.load %arg3[%c0_20, %c0_21] : memref<10x32xbf16, #tpu.memory_space<vmem>>, vector<10x32xbf16>
    %c0_22 = arith.constant 0 : index
    %c0_23 = arith.constant 0 : index
    %73 = vector.load %arg5[%c0_22, %c0_23] : memref<32x128xbf16, #tpu.memory_space<vmem>>, vector<32x128xbf16>
    %cst_24 = arith.constant dense<0.000000e+00> : vector<10x128xf32>
    %74 = tpu.matmul %72, %73, %cst_24 {dimension_numbers = #tpu.dot_dimension_numbers<[1], [0], [0], [1], [0, 0, 1, 1], [], []>} : vector<10x32xbf16>, vector<32x128xbf16>, vector<10x128xf32> -> vector<10x128xf32>
    %75 = tpu.iota {dimensions = array<i32: 1>} : vector<40x10xi32>
    %76 = arith.sitofp %75 : vector<40x10xi32> to vector<40x10xf32>
    %77 = vector.broadcast %12 : vector<40x1xf32> to vector<40x10xf32>
    %78 = arith.subf %76, %77 : vector<40x10xf32>
    %79 = math.absf %78 : vector<40x10xf32>
    %cst_25 = arith.constant 5.000000e-01 : f32
    %80 = vector.broadcast %cst_25 : f32 to vector<40x10xf32>
    %81 = arith.cmpf olt, %79, %80 : vector<40x10xf32>
    %82 = arith.extui %81 : vector<40x10xi1> to vector<40x10xi32>
    %83 = arith.sitofp %82 : vector<40x10xi32> to vector<40x10xf32>
    %cst_26 = arith.constant dense<0.000000e+00> : vector<40x128xf32>
    %84 = tpu.matmul %83, %74, %cst_26 {dimension_numbers = #tpu.dot_dimension_numbers<[1], [0], [0], [1], [0, 0, 1, 1], [], []>} : vector<40x10xf32>, vector<10x128xf32>, vector<40x128xf32> -> vector<40x128xf32>
    %c0_27 = arith.constant 0 : index
    %85 = memref.load %arg1[%c0_27] : memref<1xi32, #tpu.memory_space<smem>>
    %86 = arith.sitofp %85 : i32 to f32
    %cst_28 = arith.constant 1.000000e+00 : f32
    %87 = vector.broadcast %cst_28 : f32 to vector<40x1xf32>
    %88 = arith.cmpf oge, %28, %87 : vector<40x1xf32>
    %89 = vector.broadcast %86 : f32 to vector<40x1xf32>
    %90 = arith.addf %28, %89 : vector<40x1xf32>
    %91 = arith.select %88, %90, %28 : vector<40x1xi1>, vector<40x1xf32>
    %c0_29 = arith.constant 0 : index
    %c0_30 = arith.constant 0 : index
    %92 = vector.load %arg7[%c0_29, %c0_30] : memref<2x128xf32, #tpu.memory_space<vmem>>, vector<1x128xf32>
    %93 = vector.broadcast %91 : vector<40x1xf32> to vector<40x128xf32>
    %94 = vector.broadcast %92 : vector<1x128xf32> to vector<40x128xf32>
    %95 = arith.mulf %93, %94 : vector<40x128xf32>
    %c1_31 = arith.constant 1 : index
    %c0_32 = arith.constant 0 : index
    %96 = vector.load %arg7[%c1_31, %c0_32] : memref<2x128xf32, #tpu.memory_space<vmem>>, vector<1x128xf32>
    %97 = vector.broadcast %96 : vector<1x128xf32> to vector<40x128xf32>
    %98 = arith.addf %95, %97 : vector<40x128xf32>
    %99 = math.cos %98 : vector<40x128xf32>
    %100 = arith.addf %71, %84 : vector<40x128xf32>
    %101 = arith.addf %100, %99 : vector<40x128xf32>
    %c0_33 = arith.constant 0 : index
    %c0_34 = arith.constant 0 : index
    %102 = vector.load %arg8[%c0_33, %c0_34] : memref<40x128xf32, #tpu.memory_space<vmem>>, vector<40x128xf32>
    tpu.vector_store %arg8[%c0_33, %c0_34], %101 {strides = array<i32>} : memref<40x128xf32, #tpu.memory_space<vmem>>, vector<40x128xf32>,
    return
  }
  func.func @transform_0(%arg0: i32, %arg1: memref<1xi32, #tpu.memory_space<smem>>) -> (i32, i32) {
    %c0_i32 = arith.constant 0 : i32
    %c0_i32_0 = arith.constant 0 : i32
    return %arg0, %c0_i32 : i32, i32
  }
  func.func @transform_1(%arg0: i32, %arg1: memref<1xi32, #tpu.memory_space<smem>>) -> (i32, i32) {
    %c0_i32 = arith.constant 0 : i32
    %c0_i32_0 = arith.constant 0 : i32
    %c0_i32_1 = arith.constant 0 : i32
    return %c0_i32, %c0_i32_0 : i32, i32
  }
  func.func @transform_2(%arg0: i32, %arg1: memref<1xi32, #tpu.memory_space<smem>>) -> (i32, i32) {
    %c0_i32 = arith.constant 0 : i32
    %c0_i32_0 = arith.constant 0 : i32
    %c0_i32_1 = arith.constant 0 : i32
    return %c0_i32, %c0_i32_0 : i32, i32
  }
  func.func @transform_3(%arg0: i32, %arg1: memref<1xi32, #tpu.memory_space<smem>>) -> (i32, i32) {
    %c0_i32 = arith.constant 0 : i32
    %c0_i32_0 = arith.constant 0 : i32
    %c0_i32_1 = arith.constant 0 : i32
    return %c0_i32, %c0_i32_0 : i32, i32
  }
  func.func @transform_4(%arg0: i32, %arg1: memref<1xi32, #tpu.memory_space<smem>>) -> (i32, i32) {
    %c0_i32 = arith.constant 0 : i32
    %c0_i32_0 = arith.constant 0 : i32
    %c0_i32_1 = arith.constant 0 : i32
    return %c0_i32, %c0_i32_0 : i32, i32
  }
  func.func @transform_5(%arg0: i32, %arg1: memref<1xi32, #tpu.memory_space<smem>>) -> (i32, i32) {
    %c0_i32 = arith.constant 0 : i32
    %c0_i32_0 = arith.constant 0 : i32
    %c0_i32_1 = arith.constant 0 : i32
    return %c0_i32, %c0_i32_0 : i32, i32
  }
  func.func @transform_6(%arg0: i32, %arg1: memref<1xi32, #tpu.memory_space<smem>>) -> (i32, i32) {
    %c0_i32 = arith.constant 0 : i32
    %c0_i32_0 = arith.constant 0 : i32
    return %arg0, %c0_i32 : i32, i32
  }
}

</mosaic_0001>

<bundles_post_ra>
// kernel: input_process_forward.1
= control target key start
LH: loop header
LB: loop body
LE: loop exit
PB: predicated region body
PF: predicated region fallthrough
CT: control target
= control target key end

     0   :  { %s3081_s0 = inlined_call_operand.<no memory space> [shape: s32[1], index: 0, kind: input, shape index: {}]   ;;  %s3082_s1 = inlined_call_operand.vmem [shape: bf16[70,16], index: 1, kind: input, shape index: {}]   ;;  %s3083_s2 = inlined_call_operand.vmem [shape: bf16[10,32], index: 2, kind: input, shape index: {}]   ;;  %s3084_s3 = inlined_call_operand.vmem [shape: bf16[16,512], index: 3, kind: input, shape index: {}]   ;;  %s3085_s4 = inlined_call_operand.vmem [shape: bf16[32,128], index: 4, kind: input, shape index: {}]   ;;  %s3086_s5 = inlined_call_operand.vmem [shape: f32[4,128], index: 5, kind: input, shape index: {}]   ;;  %s3087_s6 = inlined_call_operand.vmem [shape: f32[2,128], index: 6, kind: input, shape index: {}]   ;;  %s3088_s7 = inlined_call_operand.vmem [shape: f32[70,128], index: 7, kind: output, shape index: {}]  }
   0x1   :  { %12 = sst [smem:[#allocation3]] %s3081_s0 }
   0x2   :  { %s2148_s26 = smov 0   ;;  %s2150_s27 = smov 0  }
   0x3   :  { %s2152_s28 = smov 0  }
   0x4 LB: > { %s2161_s0 = sadd.s32 4294967295, %s2063_s28   ;;  %s2163_s29 = sadd.s32 1, %s2063_s28   ;;  %s2063_s28 = sphi %s2152_s28, %s3105_s28   ;;  %s2059_s27 = sphi %s2150_s27, %s3104_s27   ;;  %s2055_s26 = sphi %s2148_s26, %s3103_s26  }
   0x5   : > { %s153_s30 = ssub.s32 %s2063_s28, %s2163_s29  ;;  %s156_s8 = sadd.s32 1, %s2059_s27 }
   0x6   : > { %p154_p0 = scmp.eq.s32.totalorder %s153_s30, 0  ;;  %p166_p1 = scmp.ne.s32.totalorder %s2059_s27, %s2055_s26 }
   0x7   : > { %p167_p2 = scmp.eq.s32.totalorder %s2161_s0, 1  ;;  %p1787_p3 = scmp.ge.s32.totalorder %s2063_s28, 1 }
   0x8   : > { %s2171_s9 = scalar_select %p154_p0, %s2059_s27, %s156_s8  }
   0x9   : > { %p2173_p4 = por %p167_p2, %p166_p1  ;;  %p223_p5 = scmp.lt.s32.totalorder %s2063_s28, 3 }
   0xb   : > { %p224_p6 = pnand %p1787_p3, %p223_p5 }
   0xc   : > { %s2190_s19 = smul.u32 (!%p224_p6), 5, %s2161_s0  ;;  %s1830_s24 = sshll.u32 (!%p224_p6), %s2161_s0, 2 }
   0xd   : > { %227 = sbr.rel (%p224_p6) target bundleno = 508 (0x1fc), region = 44  ;;  %s497_s25 = scvt.s32.f32 (!%p224_p6), %s1830_s24 }
   0xe   : > { %p261_p7 = scmp.lt.s32.totalorder (!%p224_p6), %s2190_s19, 8  ;;  %s253_s23 = sand.u32 (!%p224_p6), 1, %s2055_s26  }
   0xf   : > { %s2796_s26 = smul.u32 (!%p224_p6), 40, %s253_s23 }
  0x11   : > { %s2837_s24 = scalar_lea.vmem (!%p224_p6), [#allocation4], %s2796_s26  }
  0x12   : > { %v1799_v0 = vld [vmem:[%s3084_s3] sm:$0xf]  ;;  %v1891_v1 = vld [vmem:[%s3084_s3 + $0xc] sm:$0xf0]  ;;  %v1889_v2 = vld [vmem:[%s3084_s3 + $0x4] sm:$0xf]  ;;  %v420_v22 = vlaneseq  ;;  %v498_v58 = vstv %s497_s25 }
  0x13   : > { %v1800_v3 = vor.u32 %v1891_v1, %v1799_v0  ;;  %v1801_v4 = vld [vmem:[%s3084_s3 + $0x10] sm:$0xf0]  ;;  %v1807_v5 = vld [vmem:[%s3084_s3 + $0x8] sm:$0xf]  ;;  %v1892_v7 = vld [vmem:[%s3084_s3 + $0x14] sm:$0xf0] }
  0x14   : > { %v1804_v6 = vor.u32 %v1889_v2, %v1801_v4  ;;  %v1895_v8 = vld [vmem:[%s3085_s4 + $0x8] sm:$0xff]  ;;  %v1808_v10 = vor.u32 %v1892_v7, %v1807_v5  ;;  %v1809_v11 = vld [vmem:[%s3084_s3 + $0x18] sm:$0xf0]  ;;  %s262_s12 = scalar_select %p261_p7, %s2190_s19, 8  ;;  %vm318_vm0 = vcmask 130048   ;;  %v1894_v18 = vld [vmem:[%s3085_s4] sm:$0xff] }
  0x15   : > { %v1890_v9 = vld [vmem:[%s3084_s3 + $0xc] sm:$0xf]  ;;  %335 = vmatpush.bf16.msra.mxu0 %v1800_v3  ;;  %v1838_v19 = vld [vmem:[%s3083_s2] sm:$0xf]  ;;  %v1893_v20 = vld [vmem:[%s3083_s2] sm:$0x10] }
  0x16   : > { %358 = vmatpush.bf16.msra.mxu1 %v1804_v6  ;;  %1897 = vmatpush.bf16.msra.mxu2 %v1804_v6  ;;  %v1812_v12 = vor.u32 %v1890_v9, %v1809_v11  ;;  %s1788_s13 = sshll.u32 %s262_s12, 2  ;;  %v1839_v21 = vor.u32 %v1893_v20, %v1838_v19  ;;  %vm635_vm1 = vcmask 261120   ;;  %v421_v23 = vshrl.u32 %v420_v22, 7  ;;  %s1558_s25 = ssub.s32 (%p2173_p4), 9, %s2190_s19 }
  0x17   : > { %1898 = vmatpush.bf16.msra.mxu3 %v1804_v6  ;;  %s264_s16 = scalar_lea.vmem %s3082_s1, %s1788_s13  ;;  %vm697_vm12 = vcmask 1041408   ;;  %vm681_vm15 = vcmask 80896   ;;  %s1896_s28 = smul.u32 (%p2173_p4), 40, %s2161_s0 }
  0x18   : > { %v1887_v13 = vld [vmem:[%s264_s16] sm:$0xff]  ;;  %v1888_v14 = vld [vmem:[%s264_s16 + $0x8] sm:$0xff]  ;;  %v280_v15 = vld [vmem:[%s264_s16 + $0x10] sm:$0xf]  ;;  %v422_v24 = vadd.s32 8, %v421_v23  ;;  %v423_v27 = vadd.s32 16, %v421_v23  ;;  %v426_v32 = vcvt.s32.f32 %v421_v23 }
  0x19   : > { %645 = vmatpush.bf16.msrb.mxu0 %v1895_v8  ;;  %v294_v16 = vunpack.c.l.b16 %v280_v15  ;;  %1816 = vmatmul.msk.bf16.vlgmr.msra.gmra.mxu1 %vm318_vm0, %v1887_v13  ;;  %v424_v35 = vadd.s32 24, %v421_v23  ;;  %v425_v45 = vadd.s32 32, %v421_v23  ;;  %s733_s16 = sld [smem:[#allocation3]]  ;;  %p1559_p8 = scmp.lt.s32.totalorder (%p2173_p4), %s1558_s25, 5 }
  0x1a   : > { %381 = vmatpush.bf16.msrb.mxu2 %v1808_v10  ;;  %1813 = vmatmul.msk.bf16.vlgmr.msra.gmra.mxu0 %vm318_vm0, %v1887_v13  ;;  %v427_v25 = vcvt.s32.f32 %v422_v24  ;;  %v428_v28 = vcvt.s32.f32 %v423_v27  ;;  %v431_v36 = vadd.f32 0.5, %v426_v32  ;;  %s3028_s11 = scalar_lea.vmem (%p2173_p4), %s3088_s7, %s1896_s28  }
  0x1b   : > { %404 = vmatpush.bf16.msrb.mxu3 %v1812_v12  ;;  %1817 = vmatmul.msk.bf16.vlgmr.msra.gmra.mxu2 %vm318_vm0, %v1888_v14  ;;  %v297_v17 = vpack.c.b16 %v294_v16, %v294_v16  ;;  %v429_v39 = vcvt.s32.f32 %v424_v35  ;;  %v430_v48 = vcvt.s32.f32 %v425_v45 }
  0x1c   : > { %v432_v26 = vadd.f32 0.5, %v427_v25  ;;  %v433_v30 = vadd.f32 0.5, %v428_v28  ;;  %v2236_v42 = vmul.f32 0.1, %v431_v36 }
  0x1d   : > { %1818 = vmatmul.msk.bf16.vlgmr.msra.gmra.mxu3 %vm318_vm0, %v297_v17  ;;  %646 = vmatpush.bf16.msrb.mxu0 %v1894_v18  ;;  %v434_v40 = vadd.f32 0.5, %v429_v39  ;;  %v435_v51 = vadd.f32 0.5, %v430_v48 }
  0x1e   : > { %v437_v29 = vmul.f32 0.1, %v432_v26  ;;  %v438_v31 = vmul.f32 0.1, %v433_v30  ;;  %v441_v49 = vfloor.f32 %v2236_v42 }
  0x1f   : > { %v439_v44 = vmul.f32 0.1, %v434_v40  ;;  %v440_v54 = vmul.f32 0.1, %v435_v51  ;;  %s734_s17 = scvt.s32.f32 %s733_s16 }
  0x20   : > { %v442_v33 = vfloor.f32 %v437_v29  ;;  %v443_v34 = vfloor.f32 %v438_v31  ;;  %v446_v55 = vmul.f32 10.0, %v441_v49 }
  0x21   : > { %v444_v46 = vfloor.f32 %v439_v44  ;;  %v445_v59 = vfloor.f32 %v440_v54 }
  0x22   : > { %v448_v37 = vmul.f32 10.0, %v443_v34  ;;  %v447_v38 = vmul.f32 10.0, %v442_v33  ;;  %v2253_v1 = vsub.f32 %v426_v32, %v446_v55  ;;  %v2261_v16 = vadd.f32 %v498_v58, %v443_v34 }
  0x23   : > { %v449_v52 = vmul.f32 10.0, %v444_v46  ;;  %v2248_v60 = vadd.f32 %v498_v58, %v444_v46  ;;  %v450_v62 = vmul.f32 10.0, %v445_v59  ;;  %v2250_v63 = vadd.f32 %v498_v58, %v445_v59 }
  0x24   : > { %v2234_v41 = vsub.f32 %v428_v28, %v448_v37  ;;  %v2238_v43 = vsub.f32 %v427_v25, %v447_v38  ;;  %v456_v7 = vadd.f32 0.5, %v2253_v1  ;;  %v2264_v20 = vadd.f32 %v498_v58, %v442_v33  ;;  %v1998_v37 = vld [vmem:[%s3086_s5 + $0x1] ss:$0 sm:$0xff] }
  0x25   : > { %v2246_v57 = vsub.f32 %v429_v39, %v449_v52  ;;  %v2255_v3 = vsub.f32 %v430_v48, %v450_v62  ;;  %vm506_vm5 = vcmp.lt.f32.partialorder %v2261_v16, 1.0  ;;  %vm508_vm7 = vcmp.lt.f32.partialorder %v2250_v63, 1.0  ;;  %v2301_v39 = vld [vmem:[%s3086_s5] ss:$0 sm:$0xff] }
  0x26   : > { %v458_v47 = vadd.f32 0.5, %v2234_v41  ;;  %v457_v50 = vadd.f32 0.5, %v2238_v43  ;;  %vm505_vm6 = vcmp.lt.f32.partialorder %v2264_v20, 1.0  ;;  %vm507_vm9 = vcmp.lt.f32.partialorder %v2248_v60, 1.0 }
  0x27   : > { %v459_v0 = vadd.f32 0.5, %v2246_v57  ;;  %v460_v5 = vadd.f32 0.5, %v2255_v3 }
  0x28   : > { %v463_v53 = vmul.f32 0.2, %v458_v47  ;;  %v462_v56 = vmul.f32 0.2, %v457_v50  ;;  %v2313_v47 = vadd.f32 %v498_v58, %v441_v49 }
  0x29   : > { %v464_v6 = vmul.f32 0.2, %v459_v0  ;;  %v465_v9 = vmul.f32 0.2, %v460_v5 }
  0x2a   : > { %1814 = vmatmul.msk.bf16.gmra.mxu0 %vm318_vm0, %v1888_v14  ;;  %v468_v61 = vfloor.f32 %v463_v53  ;;  %v467_v2 = vfloor.f32 %v462_v56  ;;  %vm504_vm11 = vcmp.lt.f32.partialorder %v2313_v47, 1.0  ;;  %vm735_vm14 = vcmp.ge.f32.partialorder %v2313_v47, 1.0 }
  0x2b   : > { %1819 = vmatmul.msk.bf16.vlgmr.msrb.gmra.mxu2 %vm318_vm0, %v1887_v13  ;;  %v470_v11 = vfloor.f32 %v465_v9  ;;  %v469_v12 = vfloor.f32 %v464_v6 }
  0x2c   : > { %v473_v4 = vmul.f32 5.0, %v468_v61  ;;  %v472_v8 = vmul.f32 5.0, %v467_v2 }
  0x2d   : > { %1822 = vmatmul.msk.bf16.vlgmr.msrb.gmra.mxu3 %vm318_vm0, %v1887_v13  ;;  %v461_v13 = vmul.f32 0.2, %v456_v7  ;;  %v475_v15 = vmul.f32 5.0, %v470_v11  ;;  %v474_v18 = vmul.f32 5.0, %v469_v12 }
  0x2e   : > { %v478_v10 = vsub.f32 %v2234_v41, %v473_v4 }
  0x2f   : > { %v466_v19 = vfloor.f32 %v461_v13  ;;  %v479_v27 = vsub.f32 %v2246_v57, %v474_v18 }
  0x30   : > { %vm483_vm2 = vcmp.lt.f32.partialorder %v478_v10, 0.5 }
  0x31   : > { %v471_v28 = vmul.f32 5.0, %v466_v19  ;;  %vm484_vm8 = vcmp.lt.f32.partialorder %v479_v27, 0.5 }
  0x33   : > { %v476_v35 = vsub.f32 %v2253_v1, %v471_v28  ;;  %v2337_v28 = vld [vmem:[%s3086_s5 + $0x2] ss:$0 sm:$0xff] }
  0x35   : > { %vm481_vm10 = vcmp.lt.f32.partialorder %v476_v35, 0.5 }
  0x3a   : > { %1815 = vmatmul.msk.bf16.gmra.mxu0 %vm318_vm0, %v297_v17 }
  0x3b   : > { %1820 = vmatmul.msk.bf16.gmra.mxu2 %vm318_vm0, %v1888_v14 }
  0x3d   : > { %1823 = vmatmul.msk.bf16.gmra.mxu3 %vm318_vm0, %v1888_v14  ;;  %v477_v14 = vsub.f32 %v2238_v43, %v472_v8 }
  0x3f   : > { %vm482_vm3 = vcmp.lt.f32.partialorder %v477_v14, 0.5 }
  0x4a   : > { %1848 = vmatmul.msk.bf16.vlgmr.msrb.gmra.mxu0 %vm635_vm1, %v1839_v21  ;;  %v2097_v21 = vmov 0.0   ;;  %vm736_vm1 = vcmp.ge.f32.partialorder %v2264_v20, 1.0 }
  0x4b   : > { %1821 = vmatmul.msk.bf16.gmra.mxu2 %vm318_vm0, %v297_v17  ;;  %v2267_v23 = vsel %vm483_vm2, 1.0, %v2097_v21  ;;  %v2271_v26 = vsel %vm482_vm3, 1.0, %v2097_v21  ;;  %v2281_v31 = vsel %vm506_vm5, 1.0, %v2097_v21  ;;  %v2285_v33 = vsel %vm505_vm6, 1.0, %v2097_v21 }
  0x4c   : > { %v526_v30 = vsub.f32 1.0, %v2267_v23  ;;  %v525_v32 = vsub.f32 1.0, %v2271_v26  ;;  %v2290_v36 = vsel %vm508_vm7, 1.0, %v2097_v21  ;;  %v520_v44 = vmul.f32 %v2285_v33, %v2271_v26 }
  0x4d   : > { %1824 = vmatmul.msk.bf16.gmra.mxu3 %vm318_vm0, %v297_v17  ;;  %v480_v17 = vsub.f32 %v2255_v3, %v475_v15  ;;  %v2309_v46 = vsel %vm484_vm8, 1.0, %v2097_v21  ;;  %v2322_v61 = vsel %vm507_vm9, 1.0, %v2097_v21  ;;  %v1825_v62 = vsel %vm481_vm10, 1.0, %v2097_v21 }
  0x4e   : > { %v531_v38 = vmul.f32 %v2281_v31, %v526_v30  ;;  %v530_v45 = vmul.f32 %v2285_v33, %v525_v32  ;;  %v527_v42 = vsub.f32 1.0, %v2309_v46  ;;  %v1831_v5 = vsel %vm504_vm11, 1.0, %v2097_v21 }
  0x4f   : > { %vm485_vm4 = vcmp.lt.f32.partialorder %v480_v17, 0.5  ;;  %v524_v6 = vsub.f32 1.0, %v1825_v62  ;;  %v521_v8 = vmul.f32 %v2281_v31, %v2267_v23  ;;  %v519_v13 = vmul.f32 %v1831_v5, %v1825_v62 }
  0x50   : > { %v2276_v29 = vsel %vm485_vm4, 1.0, %v2097_v21  ;;  %v532_v4 = vmul.f32 %v2322_v61, %v527_v42  ;;  %v534_v15 = vsub.f32 1.0, %v1831_v5  ;;  %vm737_vm10 = vcmp.ge.f32.partialorder %v2261_v16, 1.0 }
  0x51   : > { %v528_v34 = vsub.f32 1.0, %v2276_v29  ;;  %v529_v18 = vmul.f32 %v1831_v5, %v524_v6 }
  0x53   : > { %v533_v52 = vmul.f32 %v2290_v36, %v528_v34 }
  0x96   : > { %v360_v25 = vpop.f32.mrf.mxu1 }
  0x97   : > { %v337_v24 = vpop.f32.mrf.mxu0  ;;  %v563_v19 = vadd.f32 %v1998_v37, %v360_v25 }
  0x98   : > { %v551_v17 = vadd.f32 %v2301_v39, %v337_v24  ;;  %v522_v24 = vmul.f32 %v2322_v61, %v2309_v46 }
  0x9e   : > { %v365_v40 = vpop.f32.mrf.mxu2  ;;  %v362_v51 = vpop.f32.mrf.mxu1 }
  0x9f   : > { %v565_v48 = vadd.f32 %v1998_v37, %v365_v40  ;;  %v339_v50 = vpop.f32.mrf.mxu0  ;;  %v564_v54 = vadd.f32 %v1998_v37, %v362_v51  ;;  %v2342_v40 = vld [vmem:[%s3086_s5 + $0x3] ss:$0 sm:$0xff] }
  0xa0   : > { %v552_v53 = vadd.f32 %v2301_v39, %v339_v50  ;;  %v370_v55 = vpop.f32.mrf.mxu3  ;;  %v544_v50 = vmul.f32 %v534_v15, %v524_v6 }
  0xa1   : > { %v570_v56 = vmul.f32 %v565_v48, %v531_v38  ;;  %v567_v59 = vadd.f32 %v1998_v37, %v370_v55  ;;  %v569_v58 = vmul.f32 %v564_v54, %v530_v45  ;;  %v539_v38 = vmul.f32 %v1825_v62, %v534_v15 }
  0xa2   : > { %v557_v49 = vmul.f32 %v552_v53, %v520_v44  ;;  %v556_v44 = vmul.f32 %v551_v17, %v519_v13  ;;  %v568_v45 = vmul.f32 %v563_v19, %v529_v18  ;;  %v535_v55 = vsub.f32 1.0, %v2285_v33 }
  0xa3   : > { %v572_v0 = vmul.f32 %v567_v59, %v533_v52 }
  0xa4   : > { %v574_v2 = vadd.f32 %v569_v58, %v557_v49 }
  0xa6   : > { %v367_v7 = vpop.f32.mrf.mxu2 }
  0xa7   : > { %v566_v9 = vadd.f32 %v1998_v37, %v367_v7  ;;  %v342_v10 = vpop.f32.mrf.mxu0  ;;  %v523_v7 = vmul.f32 %v2290_v36, %v2276_v29 }
  0xa8   : > { %v553_v11 = vadd.f32 %v2301_v39, %v342_v10  ;;  %v372_v12 = vpop.f32.mrf.mxu3  ;;  %v545_v10 = vmul.f32 %v535_v55, %v525_v32 }
  0xa9   : > { %v571_v14 = vmul.f32 %v566_v9, %v532_v4  ;;  %v540_v4 = vmul.f32 %v2271_v26, %v535_v55  ;;  %v2383_v55 = vstv %s734_s17 }
  0xaa   : > { %v558_v27 = vmul.f32 %v553_v11, %v521_v8 }
  0xac   : > { %v575_v35 = vadd.f32 %v570_v56, %v558_v27  ;;  %v573_v56 = vadd.f32 %v568_v45, %v556_v44 }
  0xae   : > { %v383_v48 = vpop.f32.mrf.mxu2 }
  0xaf   : > { %v580_v25 = vadd.f32 %v2337_v28, %v383_v48  ;;  %v344_v37 = vpop.f32.mrf.mxu0 }
  0xb0   : > { %v554_v51 = vadd.f32 %v2301_v39, %v344_v37  ;;  %v406_v52 = vpop.f32.mrf.mxu3 }
  0xb1   : > { %v585_v53 = vmul.f32 %v580_v25, %v539_v38  ;;  %v597_v54 = vadd.f32 %v2342_v40, %v406_v52  ;;  %v654_v38 = vand.u32 127, %v420_v22 }
  0xb2   : > { %v559_v59 = vmul.f32 %v554_v51, %v522_v24 }
  0xb3   : > { %v602_v49 = vmul.f32 %v597_v54, %v544_v50  ;;  %v590_v62 = vadd.f32 %v585_v53, %v573_v56  ;;  %v2372_v24 = vcvt.s32.f32 %v654_v38  ;;  %v538_v54 = vsub.f32 1.0, %v2290_v36 }
  0xb4   : > { %v576_v58 = vadd.f32 %v571_v14, %v559_v59  ;;  %v536_v14 = vsub.f32 1.0, %v2281_v31 }
  0xb5   : > { %v2353_v6 = vadd.f32 %v602_v49, %v590_v62  ;;  %v656_v50 = vsub.f32 %v2372_v24, %v2253_v1  ;;  %v741_v62 = vadd.f32 %v2383_v55, %v2313_v47 }
  0xb6   : > { %v385_v5 = vpop.f32.mrf.mxu2  ;;  %v541_v27 = vmul.f32 %v2267_v23, %v536_v14  ;;  %v546_v45 = vmul.f32 %v536_v14, %v526_v30 }
  0xb7   : > { %v581_v8 = vadd.f32 %v2337_v28, %v385_v5  ;;  %v347_v9 = vpop.f32.mrf.mxu0  ;;  %v661_v59 = vand.u32 2147483647, %v656_v50 }
  0xb8   : > { %v555_v33 = vadd.f32 %v2301_v39, %v347_v9  ;;  %v408_v11 = vpop.f32.mrf.mxu3 }
  0xb9   : > { %v586_v12 = vmul.f32 %v581_v8, %v540_v4  ;;  %v598_v13 = vadd.f32 %v2342_v40, %v408_v11  ;;  %v543_v4 = vmul.f32 %v2276_v29, %v538_v54  ;;  %vm666_vm13 = vcmp.lt.f32.partialorder %v661_v59, 0.5  ;;  %v2411_v11 = vld [vmem:[%s3087_s6 + $0x1] ss:$0 sm:$0xff] }
  0xba   : > { %v560_v15 = vmul.f32 %v555_v33, %v523_v7  ;;  %v548_v7 = vmul.f32 %v538_v54, %v528_v34  ;;  %v2099_v54 = vmov 683565275  }
  0xbb   : > { %v603_v17 = vmul.f32 %v598_v13, %v545_v10  ;;  %v591_v18 = vadd.f32 %v586_v12, %v574_v2  ;;  %v746_v10 = vsel %vm735_vm14, %v741_v62, %v2313_v47  ;;  %v742_v47 = vadd.f32 %v2383_v55, %v2264_v20 }
  0xbc   : > { %v2361_v19 = vadd.f32 %v572_v0, %v560_v15  ;;  %v537_v0 = vsub.f32 1.0, %v2322_v61 }
  0xbd   : > { %v2365_v26 = vadd.f32 %v603_v17, %v591_v18  ;;  %v747_v38 = vsel %vm736_vm1, %v742_v47, %v2264_v20 }
  0xbe   : > { %v388_v32 = vpop.f32.mrf.mxu2  ;;  %v542_v22 = vmul.f32 %v2309_v46, %v537_v0  ;;  %v547_v52 = vmul.f32 %v537_v0, %v527_v42  ;;  %v657_v46 = vsub.f32 %v2372_v24, %v2238_v43  ;;  %v1849_v43 = vsel %vm666_vm13, 1.0, %v2097_v21 }
  0xbf   : > { %v582_v39 = vadd.f32 %v2337_v28, %v388_v32  ;;  %v349_v44 = vpop.f32.mrf.mxu0 }
  0xc0   : > { %v411_v31 = vpop.f32.mrf.mxu3  ;;  %v662_v34 = vand.u32 2147483647, %v657_v46 }
  0xc1   : > { %v587_v48 = vmul.f32 %v582_v39, %v541_v27  ;;  %v599_v2 = vadd.f32 %v2342_v40, %v411_v31  ;;  %v659_v39 = vsub.f32 %v2372_v24, %v2246_v57 }
  0xc2   : > { %vm667_vm0 = vcmp.lt.f32.partialorder %v662_v34, 0.5 }
  0xc3   : > { %v604_v25 = vmul.f32 %v599_v2, %v546_v45  ;;  %v592_v37 = vadd.f32 %v587_v48, %v575_v35  ;;  %v1850_v18 = vsel %vm667_vm0, 1.0, %v2097_v21  ;;  %v664_v48 = vand.u32 2147483647, %v659_v39 }
  0xc4   : > { %v660_v2 = vsub.f32 %v2372_v24, %v2255_v3  ;;  %v2098_v3 = vmov 2102212464  }
  0xc5   : > { %v2377_v51 = vadd.f32 %v604_v25, %v592_v37  ;;  %vm669_vm4 = vcmp.lt.f32.partialorder %v664_v48, 0.5 }
  0xc6   : > { %v390_v23 = vpop.f32.mrf.mxu2 }
  0xc7   : > { %v583_v30 = vadd.f32 %v2337_v28, %v390_v23  ;;  %v648_v53 = vpop.f32.mrf.mxu0 }
  0xc8   : > { %v413_v61 = vpop.f32.mrf.mxu3 }
  0xc9   : > { %v588_v35 = vmul.f32 %v583_v30, %v542_v22  ;;  %v600_v56 = vadd.f32 %v2342_v40, %v413_v61  ;;  %v665_v22 = vand.u32 2147483647, %v660_v2  ;;  %v743_v30 = vadd.f32 %v2383_v55, %v2261_v16 }
  0xcb   : > { %v605_v49 = vmul.f32 %v600_v56, %v547_v52  ;;  %v593_v1 = vadd.f32 %v588_v35, %v576_v58  ;;  %v2400_v58 = vld [vmem:[%s3087_s6] ss:$0 sm:$0xff]  ;;  %v2100_v56 = vmov 2475754826   ;;  %vm670_vm9 = vcmp.lt.f32.partialorder %v665_v22, 0.5 }
  0xcc   : > { %v754_v45 = vmul.f32 %v2400_v58, %v747_v38 }
  0xcd   : > { %v2391_v42 = vadd.f32 %v605_v49, %v593_v1  ;;  %v2101_v1 = vmov 2131351028  }
  0xce   : > { %v393_v36 = vpop.f32.mrf.mxu2  ;;  %v2432_v31 = vadd.f32 %v2411_v11, %v754_v45 }
  0xcf   : > { %v584_v5 = vadd.f32 %v2337_v28, %v393_v36  ;;  %v650_v8 = vpop.f32.mrf.mxu0  ;;  %v753_v28 = vmul.f32 %v2400_v58, %v746_v10 }
  0xd0   : > { %v416_v9 = vpop.f32.mrf.mxu3  ;;  %1854 = vmatpush.msk.msrb.mxu1 %vm697_vm12, %v650_v8  ;;  %v922_v20 = vand.u32 2139095040, %v2432_v31 }
  0xd1   : > { %v2404_v33 = vmul.f32 %v584_v5, %v543_v4  ;;  %v601_v29 = vadd.f32 %v2342_v40, %v416_v9  ;;  %v2417_v13 = vadd.f32 %v2411_v11, %v753_v28  ;;  %v658_v40 = vsub.f32 %v2372_v24, %v2234_v41 }
  0xd2   : > { %716 = vmatpush.msrb.mxu1 %v648_v53  ;;  %v923_v57 = vshrl.u32 %v922_v20, 23  ;;  %v2103_v28 = vmov 1326507024  }
  0xd3   : > { %v2413_v12 = vmul.f32 %v601_v29, %v548_v7  ;;  %1855 = vmatmul.msk.f32.vlgmr.msrb.gmra.mxu1 %vm681_vm15, %v1849_v43  ;;  %v768_v14 = vand.u32 2139095040, %v2417_v13  ;;  %v663_v27 = vand.u32 2147483647, %v658_v40  ;;  %v765_v52 = vand.u32 2147483647, %v2417_v13 }
  0xd4   : > { %v1863_v23 = vadd.s32 4294967169, %v923_v57  ;;  %v2102_v7 = vmov 920167782   ;;  %v1852_v29 = vsel %vm669_vm4, 1.0, %v2097_v21  ;;  %v748_v57 = vsel %vm737_vm10, %v743_v30, %v2261_v16 }
  0xd5   : > { %v769_v17 = vshrl.u32 %v768_v14, 23  ;;  %vm668_vm2 = vcmp.lt.f32.partialorder %v663_v27, 0.5  ;;  %v772_v53 = vand.u32 8388607, %v765_v52 }
  0xd6   : > { %v395_v15 = vpop.f32.mrf.mxu2  ;;  %v1851_v37 = vsel %vm668_vm2, 1.0, %v2097_v21 }
  0xd7   : > { %v1860_v44 = vadd.s32 4294967169, %v769_v17  ;;  %v773_v36 = vor.u32 8388608, %v772_v53 }
  0xd8   : > { %v418_v32 = vpop.f32.mrf.mxu3 }
  0xd9   : > { %v775_v41 = vadd.s32 1, %v1860_v44  ;;  %v2479_v14 = vshll.u32 %v773_v36, 8 }
  0xdb   : > { %1856 = vmatmul.msk.f32.gmra.mxu1 %vm681_vm15, %v1850_v18  ;;  %vm776_vm3 = vcmp.gt.s32.totalorder %v775_v41, 0  ;;  %v929_v18 = vadd.s32 1, %v1863_v23  ;;  %v814_v32 = vand.u32 65535, %v2479_v14  ;;  %v815_v45 = vshrl.u32 %v2479_v14, 16 }
  0xdc   : > { %v777_v0 = vsel %vm776_vm3, %v775_v41, 0  ;;  %v919_v41 = vand.u32 2147483647, %v2432_v31 }
  0xdd   : > { %v779_v25 = vand.u32 31, %v777_v0  ;;  %v2447_v61 = vshrl.u32 %v777_v0, 5  ;;  %vm930_vm11 = vcmp.gt.s32.totalorder %v929_v18, 0  ;;  %v1853_v0 = vsel %vm670_vm9, 1.0, %v2097_v21 }
  0xde   : > { %v931_v53 = vsel %vm930_vm11, %v929_v18, 0  ;;  %v2104_v18 = vmov 0  }
  0xdf   : > { %v2438_v50 = vsub.s32 32, %v779_v25  ;;  %v791_v24 = vshll.u32 %v2098_v3, %v779_v25  ;;  %v782_v35 = vshll.u32 %v2099_v54, %v779_v25  ;;  %v785_v49 = vshll.u32 %v2100_v56, %v779_v25 }
  0xe0   : > { %v788_v4 = vshll.u32 %v2101_v1, %v779_v25  ;;  %v794_v9 = vshll.u32 %v2102_v7, %v779_v25  ;;  %vm797_vm5 = vcmp.lt.s32.totalorder %v2447_v61, 1  ;;  %vm799_vm6 = vcmp.lt.s32.totalorder %v2447_v61, 3 }
  0xe1   : > { %v783_v59 = vshrl.u32 %v2100_v56, %v2438_v50  ;;  %v786_v62 = vshrl.u32 %v2101_v1, %v2438_v50  ;;  %v789_v46 = vshrl.u32 %v2098_v3, %v2438_v50  ;;  %v792_v8 = vshrl.u32 %v2102_v7, %v2438_v50 }
  0xe2   : > { %v795_v47 = vshrl.u32 %v2103_v28, %v2438_v50  ;;  %vm798_vm7 = vcmp.lt.s32.totalorder %v2447_v61, 2  ;;  %vm800_vm8 = vcmp.lt.s32.totalorder %v2447_v61, 4  ;;  %v2510_v22 = vshrl.u32 %v931_v53, 5 }
  0xe3   : > { %1857 = vmatmul.msk.f32.gmra.mxu1 %vm681_vm15, %v1851_v37  ;;  %v2458_v5 = vor.u32 %v783_v59, %v782_v35  ;;  %v2463_v43 = vor.u32 %v786_v62, %v785_v49  ;;  %v2465_v10 = vor.u32 %v789_v46, %v788_v4  ;;  %v793_v34 = vor.u32 %v792_v8, %v791_v24 }
  0xe4   : > { %v796_v15 = vor.u32 %v795_v47, %v794_v9  ;;  %v2508_v49 = vand.u32 8388607, %v919_v41  ;;  %v933_v9 = vand.u32 31, %v931_v53  ;;  %vm951_vm14 = vcmp.lt.s32.totalorder %v2510_v22, 1 }
  0xe5   : > { %v805_v40 = vsel %vm797_vm5, %v2458_v5, %v2463_v43  ;;  %v806_v17 = vsel %vm800_vm8, %v793_v34, 920167782  ;;  %v809_v38 = vsel %vm797_vm5, %v2463_v43, %v2465_v10  ;;  %vm954_vm1 = vcmp.lt.s32.totalorder %v2510_v22, 4 }
  0xe6   : > { %v807_v27 = vsel %vm799_vm6, %v2465_v10, %v806_v17  ;;  %v810_v44 = vsel %vm800_vm8, %v796_v15, 1326507024  ;;  %v927_v15 = vor.u32 8388608, %v2508_v49  ;;  %vm953_vm3 = vcmp.lt.s32.totalorder %v2510_v22, 3 }
  0xe7   : > { %v808_v39 = vsel %vm798_vm7, %v805_v40, %v807_v27  ;;  %v811_v48 = vsel %vm799_vm6, %v793_v34, %v810_v44  ;;  %v755_v34 = vmul.f32 %v2400_v58, %v748_v57  ;;  %v936_v57 = vshll.u32 %v2099_v54, %v933_v9 }
  0xe8   : > { %v838_v2 = vand.u32 65535, %v808_v39  ;;  %v839_v20 = vshrl.u32 %v808_v39, 16  ;;  %v812_v25 = vsel %vm798_vm7, %v809_v38, %v811_v48  ;;  %v934_v38 = vsub.s32 32, %v933_v9 }
  0xe9   : > { %v816_v37 = vand.u32 65535, %v812_v25  ;;  %v817_v23 = vshrl.u32 %v812_v25, 16  ;;  %vm952_vm4 = vcmp.lt.s32.totalorder %v2510_v22, 2 }
  0xea   : > { %v841_v24 = vmul.u32 %v839_v20, %v814_v32  ;;  %v840_v35 = vmul.u32 %v838_v2, %v814_v32  ;;  %v842_v59 = vmul.u32 %v838_v2, %v815_v45  ;;  %v843_v21 = vmul.u32 %v839_v20, %v815_v45 }
  0xeb   : > { %1858 = vmatmul.msk.f32.gmra.mxu1 %vm681_vm15, %v1852_v29  ;;  %v818_v62 = vmul.u32 %v816_v37, %v814_v32  ;;  %v819_v4 = vmul.u32 %v817_v23, %v814_v32  ;;  %v820_v46 = vmul.u32 %v816_v37, %v815_v45  ;;  %v821_v16 = vmul.u32 %v817_v23, %v815_v45 }
  0xec   : > { %v844_v36 = vshll.u32 %v841_v24, 16  ;;  %v846_v8 = vshll.u32 %v842_v59, 16  ;;  %v845_v47 = vshrl.u32 %v841_v24, 16  ;;  %v781_v45 = vshrl.u32 %v2099_v54, %v2438_v50 }
  0xed   : > { %v822_v30 = vshll.u32 %v819_v4, 16  ;;  %v824_v29 = vshll.u32 %v820_v46, 16  ;;  %v823_v32 = vshrl.u32 %v819_v4, 16  ;;  %v847_v2 = vshrl.u32 %v842_v59, 16 }
  0xee   : > { %vm848_vm12 = vc.u32 %v840_v35, %v844_v36  ;;  %v850_v40 = vadd.s32 %v844_v36, %v840_v35  ;;  %v802_v20 = vsel %vm800_vm8, %v2465_v10, 2102212464  ;;  %v801_v37 = vsel %vm797_vm5, %v781_v45, %v2458_v5 }
  0xef   : > { %vm826_vm13 = vc.u32 %v818_v62, %v822_v30  ;;  %v828_v17 = vadd.s32 %v822_v30, %v818_v62  ;;  %v849_v27 = vsel %vm848_vm12, 1, %v2104_v18  ;;  %v803_v50 = vsel %vm799_vm6, %v2463_v43, %v802_v20 }
  0xf0   : > { %v827_v39 = vsel %vm826_vm13, 1, %v2104_v18  ;;  %v851_v44 = vadd.s32 %v849_v27, %v843_v21  ;;  %v825_v23 = vshrl.u32 %v820_v46, 16  ;;  %v2532_v53 = vadd.s32 %v850_v40, %v846_v8 }
  0xf1   : > { %v829_v48 = vadd.s32 %v827_v39, %v821_v16  ;;  %vm830_vm0 = vc.u32 %v828_v17, %v824_v29  ;;  %v937_v10 = vshrl.u32 %v2100_v56, %v934_v38  ;;  %v939_v59 = vshll.u32 %v2100_v56, %v933_v9 }
  0xf2   : > { %v804_v49 = vsel %vm798_vm7, %v801_v37, %v803_v50  ;;  %v940_v4 = vshrl.u32 %v2101_v1, %v934_v38  ;;  %v942_v5 = vshll.u32 %v2101_v1, %v933_v9  ;;  %v943_v43 = vshrl.u32 %v2098_v3, %v934_v38 }
  0xf3   : > { %1859 = vmatmul.msk.f32.gmra.mxu1 %vm681_vm15, %v1853_v0  ;;  %vm852_vm15 = vc.u32 %v850_v40, %v846_v8  ;;  %v831_v0 = vsel %vm830_vm0, 1, %v2104_v18  ;;  %v938_v36 = vor.u32 %v937_v10, %v936_v57  ;;  %v945_v46 = vshll.u32 %v2098_v3, %v933_v9 }
  0xf4   : > { %v853_v25 = vsel %vm852_vm15, 1, %v2104_v18  ;;  %v833_v24 = vadd.s32 %v831_v0, %v829_v48  ;;  %v941_v16 = vor.u32 %v940_v4, %v939_v59  ;;  %v946_v30 = vshrl.u32 %v2102_v7, %v934_v38 }
  0xf5   : > { %v855_v35 = vadd.s32 %v853_v25, %v851_v44  ;;  %v948_v29 = vshll.u32 %v2102_v7, %v933_v9  ;;  %v944_v40 = vor.u32 %v943_v43, %v942_v5  ;;  %v949_v17 = vshrl.u32 %v2103_v28, %v934_v38 }
  0xf6   : > { %v834_v62 = vadd.s32 %v833_v24, %v823_v32  ;;  %v947_v27 = vor.u32 %v946_v30, %v945_v46  ;;  %v959_v9 = vsel %vm951_vm14, %v938_v36, %v941_v16  ;;  %v2562_v48 = vadd.f32 %v2411_v11, %v755_v34 }
  0xf7   : > { %v856_v21 = vadd.s32 %v855_v35, %v845_v47  ;;  %v858_v47 = vmul.u32 %v2479_v14, %v804_v49  ;;  %v950_v39 = vor.u32 %v949_v17, %v948_v29  ;;  %v963_v45 = vsel %vm951_vm14, %v941_v16, %v944_v40 }
  0xf8   : > { %v2542_v8 = vadd.s32 %v834_v62, %v825_v23  ;;  %v960_v44 = vsel %vm954_vm1, %v947_v27, 920167782  ;;  %v2559_v14 = vshll.u32 %v927_v15, 8  ;;  %v935_v20 = vshrl.u32 %v2099_v54, %v934_v38 }
  0xf9   : > { %v857_v61 = vadd.s32 %v856_v21, %v847_v2  ;;  %v961_v0 = vsel %vm953_vm3, %v944_v40, %v960_v44  ;;  %v964_v25 = vsel %vm954_vm1, %v950_v39, 1326507024  ;;  %v1076_v49 = vand.u32 2139095040, %v2562_v48 }
  0xfa   : > { %vm860_vm2 = vc.u32 %v2542_v8, %v2532_v53  ;;  %v962_v37 = vsel %vm952_vm4, %v959_v9, %v961_v0  ;;  %v965_v15 = vsel %vm953_vm3, %v947_v27, %v964_v25  ;;  %v968_v50 = vand.u32 65535, %v2559_v14 }
  0xfb   : > { %v861_v32 = vadd.s32 1, %v857_v61  ;;  %v966_v34 = vsel %vm952_vm4, %v963_v45, %v965_v15  ;;  %v969_v38 = vshrl.u32 %v2559_v14, 16  ;;  %v992_v23 = vand.u32 65535, %v962_v37 }
  0xfc   : > { %v993_v24 = vshrl.u32 %v962_v37, 16  ;;  %v970_v10 = vand.u32 65535, %v966_v34  ;;  %v971_v59 = vshrl.u32 %v966_v34, 16  ;;  %v956_v62 = vsel %vm954_vm1, %v944_v40, 2102212464 }
  0xfd   : > { %v862_v2 = vsel %vm860_vm2, %v861_v32, %v857_v61  ;;  %v994_v4 = vmul.u32 %v992_v23, %v968_v50  ;;  %v996_v21 = vmul.u32 %v992_v23, %v969_v38  ;;  %v955_v61 = vsel %vm951_vm14, %v935_v20, %v938_v36 }
  0xfe   : > { %v863_v57 = vadd.s32 %v862_v2, %v858_v47  ;;  %v995_v5 = vmul.u32 %v993_v24, %v968_v50  ;;  %v972_v46 = vmul.u32 %v970_v10, %v968_v50  ;;  %v973_v30 = vmul.u32 %v971_v59, %v968_v50 }
  0xff   : > { %v974_v29 = vmul.u32 %v970_v10, %v969_v38  ;;  %v997_v17 = vmul.u32 %v993_v24, %v969_v38  ;;  %v1000_v27 = vshll.u32 %v996_v21, 16  ;;  %v975_v39 = vmul.u32 %v971_v59, %v969_v38 }
 0x100   : > { %v864_v35 = vadd.s32 536870912, %v863_v57  ;;  %v998_v47 = vshll.u32 %v995_v5, 16  ;;  %v976_v9 = vshll.u32 %v973_v30, 16  ;;  %v957_v40 = vsel %vm953_vm3, %v941_v16, %v956_v62 }
 0x101   : > { %v978_v44 = vshll.u32 %v974_v29, 16  ;;  %v999_v45 = vshrl.u32 %v995_v5, 16  ;;  %v977_v36 = vshrl.u32 %v973_v30, 16  ;;  %v979_v38 = vshrl.u32 %v974_v29, 16 }
 0x102   : > { %v2580_v43 = vshrl.u32 %v864_v35, 30  ;;  %vm1002_vm5 = vc.u32 %v994_v4, %v998_v47  ;;  %v1004_v2 = vadd.s32 %v998_v47, %v994_v4  ;;  %vm980_vm6 = vc.u32 %v972_v46, %v976_v9 }
 0x103   : > { %v982_v25 = vadd.s32 %v976_v9, %v972_v46  ;;  %v1003_v37 = vsel %vm1002_vm5, 1, %v2104_v18  ;;  %v981_v20 = vsel %vm980_vm6, 1, %v2104_v18  ;;  %v1077_v24 = vshrl.u32 %v1076_v49, 23 }
 0x104   : > { %v866_v32 = vshll.u32 %v2580_v43, 30  ;;  %v1005_v15 = vadd.s32 %v1003_v37, %v997_v17  ;;  %vm1006_vm7 = vc.u32 %v1004_v2, %v1000_v27  ;;  %v983_v34 = vadd.s32 %v981_v20, %v975_v39 }
 0x105   : > { %vm984_vm9 = vc.u32 %v982_v25, %v978_v44  ;;  %v1007_v23 = vsel %vm1006_vm7, 1, %v2104_v18  ;;  %v1001_v10 = vshrl.u32 %v996_v21, 16  ;;  %v958_v4 = vsel %vm952_vm4, %v955_v61, %v957_v40 }
 0x106   : > { %v867_v0 = vsub.s32 %v863_v57, %v866_v32  ;;  %v985_v16 = vsel %vm984_vm9, 1, %v2104_v18  ;;  %v1009_v59 = vadd.s32 %v1007_v23, %v1005_v15  ;;  %v1073_v5 = vand.u32 2147483647, %v2562_v48 }
 0x107   : > { %v987_v35 = vadd.s32 %v985_v16, %v983_v34  ;;  %v1866_v46 = vadd.s32 4294967169, %v1077_v24  ;;  %v2594_v17 = vadd.s32 %v1004_v2, %v1000_v27  ;;  %v594_v47 = vadd.f32 %v2404_v33, %v2361_v19 }
 0x108   : > { %vm868_vm8 = vcmp.lt.s32.totalorder %v867_v0, 0  ;;  %v869_v50 = vsub.s32 0, %v867_v0  ;;  %v1010_v29 = vadd.s32 %v1009_v59, %v999_v45  ;;  %v1012_v9 = vmul.u32 %v2559_v14, %v958_v4 }
 0x109   : > { %v988_v30 = vadd.s32 %v987_v35, %v977_v36  ;;  %v1083_v49 = vadd.s32 1, %v1866_v46  ;;  %v2602_v22 = vadd.f32 %v2413_v12, %v594_v47  ;;  %v859_v61 = vadd.s32 %v2532_v53, %v2542_v8 }
 0x10a   : > { %v870_v57 = vsel %vm868_vm8, %v869_v50, %v867_v0  ;;  %v1011_v21 = vadd.s32 %v1010_v29, %v1001_v10  ;;  %v1080_v27 = vand.u32 8388607, %v1073_v5  ;;  %vm2642_vm15 = vcmp.le.f32.partialorder %v765_v52, 0.7853982 }
 0x10b   : > { %v871_v62 = vclz %v870_v57  ;;  %v2598_v39 = vadd.s32 %v988_v30, %v979_v38  ;;  %vm1084_vm11 = vcmp.gt.s32.totalorder %v1083_v49, 0  ;;  %vm767_vm0 = vcmp.lt.s32.totalorder %v2417_v13, 0 }
 0x10c   : > { %v1015_v19 = vadd.s32 1, %v1011_v21  ;;  %v1085_v33 = vsel %vm1084_vm11, %v1083_v49, 0  ;;  %v1081_v53 = vor.u32 8388608, %v1080_v27  ;;  %vm738_vm4 = vcmp.ge.f32.partialorder %v2248_v60, 1.0 }
 0x10d   : > { %v1861_v32 = vadd.s32 4294967294, %v871_v62  ;;  %vm1014_vm12 = vc.u32 %v2598_v39, %v2594_v17  ;;  %v1087_v12 = vand.u32 31, %v1085_v33  ;;  %v2610_v8 = vshrl.u32 %v1085_v33, 5 }
 0x10e   : > { %v1016_v2 = vsel %vm1014_vm12, %v1015_v19, %v1011_v21  ;;  %v2624_v59 = vshll.u32 %v1081_v53, 8  ;;  %vm2724_vm8 = vcmp.le.f32.partialorder %v919_v41, 0.7853982  ;;  %vm921_vm9 = vcmp.lt.s32.totalorder %v2432_v31, 0 }
 0x10f   : > { %vm1862_vm10 = vcmp.lt.s32.totalorder %v1861_v32, 0  ;;  %v1017_v36 = vadd.s32 %v1016_v2, %v1012_v9  ;;  %v2612_v20 = vsub.s32 32, %v1087_v12  ;;  %v1093_v38 = vshll.u32 %v2100_v56, %v1087_v12 }
 0x110   : > { %v874_v44 = vsel %vm1862_vm10, 0, %v1861_v32  ;;  %v1090_v10 = vshll.u32 %v2099_v54, %v1087_v12  ;;  %vm1105_vm13 = vcmp.lt.s32.totalorder %v2610_v8, 1  ;;  %v1099_v46 = vshll.u32 %v2098_v3, %v1087_v12 }
 0x111   : > { %v875_v40 = vsub.s32 32, %v874_v44  ;;  %v876_v45 = vshll.u32 %v867_v0, %v874_v44  ;;  %v879_v14 = vsub.s32 4294967266, %v874_v44  ;;  %v1018_v34 = vadd.s32 536870912, %v1017_v36 }
 0x112   : > { %v1094_v16 = vshrl.u32 %v2101_v1, %v2612_v20  ;;  %v1096_v0 = vshll.u32 %v2101_v1, %v1087_v12  ;;  %v1097_v23 = vshrl.u32 %v2098_v3, %v2612_v20  ;;  %v1100_v30 = vshrl.u32 %v2102_v7, %v2612_v20 }
 0x113   : > { %v877_v25 = vshrl.u32 %v859_v61, %v875_v40  ;;  %v880_v37 = vadd.s32 127, %v879_v14  ;;  %v2620_v35 = vshrl.u32 %v1018_v34, 30  ;;  %v1102_v32 = vshll.u32 %v2102_v7, %v1087_v12 }
 0x114   : > { %v2630_v29 = vor.u32 %v1094_v16, %v1093_v38  ;;  %v2632_v47 = vor.u32 %v1097_v23, %v1096_v0  ;;  %v1103_v49 = vshrl.u32 %v2103_v28, %v2612_v20  ;;  %v1091_v61 = vshrl.u32 %v2100_v56, %v2612_v20 }
 0x115   : > { %v878_v15 = vor.u32 %v877_v25, %v876_v45  ;;  %v881_v50 = vshll.u32 %v880_v37, 23  ;;  %v1020_v4 = vshll.u32 %v2620_v35, 30  ;;  %vm1108_vm14 = vcmp.lt.s32.totalorder %v2610_v8, 4 }
 0x116   : > { %v1104_v44 = vor.u32 %v1103_v49, %v1102_v32  ;;  %vm1107_vm1 = vcmp.lt.s32.totalorder %v2610_v8, 3  ;;  %v1101_v40 = vor.u32 %v1100_v30, %v1099_v46  ;;  %vm1106_vm3 = vcmp.lt.s32.totalorder %v2610_v8, 2 }
 0x117   : > { %v882_v24 = vor.u32 4788187, %v881_v50  ;;  %v885_v57 = vcvt.s32.f32 %v878_v15  ;;  %v1021_v9 = vsub.s32 %v1017_v36, %v1020_v4  ;;  %v1117_v45 = vsel %vm1105_vm13, %v2630_v29, %v2632_v47 }
 0x118   : > { %v1118_v52 = vsel %vm1108_vm14, %v1104_v44, 1326507024  ;;  %v1092_v36 = vor.u32 %v1091_v61, %v1090_v10  ;;  %v1114_v15 = vsel %vm1108_vm14, %v1101_v40, 920167782  ;;  %v2671_v34 = vand.u32 65535, %v2624_v59 }
 0x119   : > { %v883_v62 = vand.u32 2147483647, %v882_v24  ;;  %vm1022_vm2 = vcmp.lt.s32.totalorder %v1021_v9, 0  ;;  %v1023_v33 = vsub.s32 0, %v1021_v9  ;;  %v1119_v12 = vsel %vm1107_vm1, %v1101_v40, %v1118_v52 }
 0x11a   : > { %v1120_v50 = vsel %vm1106_vm3, %v1117_v45, %v1119_v12  ;;  %v744_v38 = vadd.f32 %v2383_v55, %v2248_v60  ;;  %v2679_v10 = vshrl.u32 %v2624_v59, 16  ;;  %v1115_v4 = vsel %vm1107_vm1, %v2632_v47, %v1114_v15 }
 0x11b   : > { %v886_v21 = vmul.f32 %v885_v57, %v883_v62  ;;  %v1024_v2 = vsel %vm1022_vm2, %v1023_v33, %v1021_v9  ;;  %v1125_v0 = vshrl.u32 %v1120_v50, 16  ;;  %v1013_v57 = vadd.s32 %v2594_v17, %v2598_v39 }
 0x11c   : > { %v1025_v37 = vclz %v1024_v2  ;;  %v1113_v62 = vsel %vm1105_vm13, %v1092_v36, %v2630_v29  ;;  %v1124_v46 = vand.u32 65535, %v1120_v50  ;;  %v749_v40 = vsel %vm738_vm4, %v744_v38, %v2248_v60 }
 0x11d   : > { %v887_v19 = vxor.u32 2147483648, %v886_v21  ;;  %v1116_v33 = vsel %vm1106_vm3, %v1113_v62, %v1115_v4  ;;  %v889_v45 = vsub.s32 4, %v2580_v43  ;;  %v1129_v60 = vmul.u32 %v1125_v0, %v2679_v10 }
 0x11e   : > { %v1864_v16 = vadd.s32 4294967294, %v1025_v37  ;;  %v2697_v2 = vmul.u32 %v1124_v46, %v2679_v10  ;;  %v1147_v38 = vshrl.u32 %v1116_v33, 16  ;;  %vm739_vm2 = vcmp.ge.f32.partialorder %v2250_v63, 1.0 }
 0x11f   : > { %v888_v14 = vsel %vm767_vm0, %v887_v19, %v886_v21  ;;  %v2688_v21 = vmul.u32 %v1125_v0, %v2671_v34 }
 0x120   : > { %v2662_v25 = vsel %vm2642_vm15, %v2417_v13, %v888_v14  ;;  %vm1865_vm5 = vcmp.lt.s32.totalorder %v1864_v16, 0  ;;  %v1132_v4 = vshll.u32 %v2697_v2, 16 }
 0x121   : > { %v893_v53 = vmul.f32 %v2662_v25, %v2662_v25  ;;  %v1028_v49 = vsel %vm1865_vm5, 0, %v1864_v16  ;;  %v1130_v37 = vshll.u32 %v2688_v21, 16  ;;  %v1089_v16 = vshrl.u32 %v2099_v54, %v2612_v20 }
 0x122   : > { %v1029_v17 = vsub.s32 32, %v1028_v49  ;;  %v1030_v39 = vshll.u32 %v1021_v9, %v1028_v49  ;;  %v1033_v61 = vsub.s32 4294967266, %v1028_v49  ;;  %v1126_v9 = vmul.u32 %v1124_v46, %v2671_v34 }
 0x123   : > { %v894_v23 = vmul.f32 -0.001358992, %v893_v53  ;;  %v901_v24 = vmul.f32 -0.00019511016, %v893_v53  ;;  %v1146_v46 = vand.u32 65535, %v1116_v33  ;;  %v1109_v0 = vsel %vm1105_vm13, %v1089_v16, %v1092_v36 }
 0x124   : > { %v1031_v52 = vshrl.u32 %v1013_v57, %v1029_v17  ;;  %v1034_v14 = vadd.s32 127, %v1033_v61  ;;  %v890_v57 = vsel %vm767_vm0, %v889_v45, %v2580_v43  ;;  %v1110_v20 = vsel %vm1108_vm14, %v2632_v47, 2102212464 }
 0x125   : > { %v895_v30 = vadd.f32 0.041655596, %v894_v23  ;;  %v902_v32 = vadd.f32 0.008332121, %v901_v24  ;;  %v756_v24 = vmul.f32 %v2400_v58, %v749_v40  ;;  %vm1134_vm6 = vc.u32 %v1126_v9, %v1130_v37 }
 0x126   : > { %v1032_v15 = vor.u32 %v1031_v52, %v1030_v39  ;;  %v1035_v50 = vshll.u32 %v1034_v14, 23  ;;  %v1135_v17 = vsel %vm1134_vm6, 1, %v2104_v18  ;;  %v1136_v39 = vadd.s32 %v1130_v37, %v1126_v9 }
 0x127   : > { %v896_v44 = vmul.f32 %v895_v30, %v893_v53  ;;  %v903_v19 = vmul.f32 %v902_v32, %v893_v53  ;;  %v892_v43 = vsel %vm2642_vm15, 0, %v890_v57  ;;  %v1111_v47 = vsel %vm1107_vm1, %v2630_v29, %v1110_v20 }
 0x128   : > { %v1036_v62 = vor.u32 4788187, %v1035_v50  ;;  %v1039_v32 = vcvt.s32.f32 %v1032_v15  ;;  %vm1138_vm7 = vc.u32 %v1136_v39, %v1132_v4  ;;  %v1150_v40 = vmul.u32 %v1146_v46, %v2679_v10 }
 0x129   : > { %v904_v12 = vadd.f32 -0.16666654, %v903_v19  ;;  %v897_v23 = vadd.f32 -0.4999988, %v896_v44  ;;  %v1137_v44 = vadd.s32 %v1135_v17, %v1129_v60  ;;  %v1149_v19 = vmul.u32 %v1147_v38, %v2671_v34 }
 0x12a   : > { %v1037_v49 = vand.u32 2147483647, %v1036_v62  ;;  %v1139_v27 = vsel %vm1138_vm7, 1, %v2104_v18  ;;  %v1148_v14 = vmul.u32 %v1146_v46, %v2671_v34  ;;  %v1131_v9 = vshrl.u32 %v2688_v21, 16 }
 0x12b   : > { %v905_v30 = vmul.f32 %v904_v12, %v893_v53  ;;  %v898_v61 = vmul.f32 %v897_v23, %v893_v53  ;;  %v2730_v53 = vand.u32 3, %v892_v43  ;;  %v1152_v29 = vshll.u32 %v1149_v19, 16 }
 0x12c   : > { %v1040_v33 = vmul.f32 %v1039_v32, %v1037_v49  ;;  %v1141_v37 = vadd.s32 %v1139_v27, %v1137_v44  ;;  %v2735_v15 = vadd.f32 %v2411_v11, %v756_v24  ;;  %v1112_v50 = vsel %vm1106_vm3, %v1109_v0, %v1111_v47 }
 0x12d   : > { %v906_v45 = vadd.f32 1.0, %v905_v30  ;;  %v899_v12 = vadd.f32 1.0, %v898_v61  ;;  %v1151_v16 = vmul.u32 %v1147_v38, %v2679_v10  ;;  %v1154_v23 = vshll.u32 %v1150_v40, 16 }
 0x12e   : > { %v1041_v52 = vxor.u32 2147483648, %v1040_v33  ;;  %v1043_v34 = vsub.s32 4, %v2620_v35  ;;  %v1133_v24 = vshrl.u32 %v2697_v2, 16  ;;  %vm914_vm10 = vcmp.eq.s32.totalorder %v2730_v53, 2 }
 0x12f   : > { %v907_v60 = vmul.f32 %v906_v45, %v2662_v25  ;;  %vm1156_vm11 = vc.u32 %v1148_v14, %v1152_v29  ;;  %v1158_v62 = vadd.s32 %v1152_v29, %v1148_v14  ;;  %v915_v8 = vxor.u32 2147483648, %v899_v12 }
 0x130   : > { %v1042_v41 = vsel %vm921_vm9, %v1041_v52, %v1040_v33  ;;  %v1142_v4 = vadd.s32 %v1141_v37, %v1131_v9  ;;  %v1153_v46 = vshrl.u32 %v1149_v19, 16  ;;  %v1157_v10 = vsel %vm1156_vm11, 1, %v2104_v18 }
 0x131   : > { %v1045_v21 = vsel %vm2724_vm8, %v2432_v31, %v1042_v41  ;;  %v1159_v30 = vadd.s32 %v1157_v10, %v1151_v16  ;;  %vm1160_vm12 = vc.u32 %v1158_v62, %v1154_v23  ;;  %v912_v32 = vxor.u32 2147483648, %v907_v60 }
 0x132   : > { %v1047_v57 = vmul.f32 %v1045_v21, %v1045_v21  ;;  %v1044_v20 = vsel %vm921_vm9, %v1043_v34, %v2620_v35  ;;  %v1161_v2 = vsel %vm1160_vm12, 1, %v2104_v18  ;;  %v1230_v49 = vand.u32 2139095040, %v2735_v15 }
 0x133   : > { %v1155_v39 = vshrl.u32 %v1150_v40, 16  ;;  %v1163_v43 = vadd.s32 %v1161_v2, %v1159_v30  ;;  %vm911_vm13 = vcmp.eq.s32.totalorder %v2730_v53, 0  ;;  %v2756_v61 = vadd.s32 %v1142_v4, %v1133_v24 }
 0x134   : > { %v1048_v38 = vmul.f32 -0.001358992, %v1047_v57  ;;  %v1055_v25 = vmul.f32 -0.00019511016, %v1047_v57  ;;  %v2758_v44 = vadd.s32 %v1158_v62, %v1154_v23  ;;  %v1231_v19 = vshrl.u32 %v1230_v49, 23 }
 0x135   : > { %vm910_vm14 = vcmp.lt.s32.totalorder %v2730_v53, 2  ;;  %v1164_v35 = vadd.s32 %v1163_v43, %v1153_v46  ;;  %v916_v45 = vsel %vm914_vm10, %v915_v8, %v907_v60  ;;  %v1046_v27 = vsel %vm2724_vm8, 0, %v1044_v20 }
 0x136   : > { %v1049_v0 = vadd.f32 0.041655596, %v1048_v38  ;;  %v1056_v17 = vadd.f32 0.008332121, %v1055_v25  ;;  %v1227_v40 = vand.u32 2147483647, %v2735_v15  ;;  %v913_v14 = vsel %vm911_vm13, %v899_v12, %v912_v32 }
 0x137   : > { %v1869_v52 = vadd.s32 4294967169, %v1231_v19  ;;  %v1165_v37 = vadd.s32 %v1164_v35, %v1155_v39  ;;  %v745_v41 = vadd.f32 %v2383_v55, %v2250_v63  ;;  %v1166_v16 = vmul.u32 %v2624_v59, %v1112_v50 }
 0x138   : > { %v1050_v33 = vmul.f32 %v1049_v0, %v1047_v57  ;;  %v1057_v47 = vmul.f32 %v1056_v17, %v1047_v57  ;;  %vm1168_vm15 = vc.u32 %v2756_v61, %v2758_v44  ;;  %v2771_v36 = vand.u32 3, %v1046_v27 }
 0x139   : > { %v1237_v23 = vadd.s32 1, %v1869_v52  ;;  %v1169_v24 = vadd.s32 1, %v1165_v37  ;;  %vm908_vm0 = vweird.f32 %v2417_v13  ;;  %v917_v12 = vsel %vm910_vm14, %v913_v14, %v916_v45 }
 0x13a   : > { %v1051_v29 = vadd.f32 -0.4999988, %v1050_v33  ;;  %v1058_v9 = vadd.f32 -0.16666654, %v1057_v47  ;;  %v1234_v62 = vand.u32 8388607, %v1227_v40  ;;  %v750_v25 = vsel %vm739_vm2, %v745_v41, %v2250_v63 }
 0x13b   : > { %vm1238_vm1 = vcmp.gt.s32.totalorder %v1237_v23, 0  ;;  %v1170_v59 = vsel %vm1168_vm15, %v1169_v24, %v1165_v37  ;;  %v918_v4 = vsel %vm908_vm0, nan, %v917_v12  ;;  %vm1065_vm3 = vcmp.eq.s32.totalorder %v2771_v36, 0 }
 0x13c   : > { %v1052_v60 = vmul.f32 %v1051_v29, %v1047_v57  ;;  %v1059_v34 = vmul.f32 %v1058_v9, %v1047_v57  ;;  %v1239_v50 = vsel %vm1238_vm1, %v1237_v23, 0  ;;  %v1171_v8 = vadd.s32 %v1170_v59, %v1166_v16 }
 0x13d   : > { %v1241_v57 = vand.u32 31, %v1239_v50  ;;  %vm1064_vm4 = vcmp.lt.s32.totalorder %v2771_v36, 2  ;;  %v1235_v53 = vor.u32 8388608, %v1234_v62  ;;  %v2783_v30 = vshrl.u32 %v1239_v50, 5 }
 0x13e   : > { %v1060_v55 = vadd.f32 1.0, %v1059_v34  ;;  %v1053_v46 = vadd.f32 1.0, %v1052_v60  ;;  %v1172_v13 = vadd.s32 536870912, %v1171_v8  ;;  %vm1062_vm5 = vweird.f32 %v2432_v31 }
 0x13f   : > { %v1242_v38 = vsub.s32 32, %v1241_v57  ;;  %v1244_v32 = vshll.u32 %v2099_v54, %v1241_v57  ;;  %v1247_v20 = vshll.u32 %v2100_v56, %v1241_v57  ;;  %v1250_v2 = vshll.u32 %v2101_v1, %v1241_v57 }
 0x140   : > { %v1061_v10 = vmul.f32 %v1060_v55, %v1045_v21  ;;  %v2788_v49 = vshrl.u32 %v1172_v13, 30  ;;  %v1253_v17 = vshll.u32 %v2098_v3, %v1241_v57  ;;  %v1069_v39 = vxor.u32 2147483648, %v1053_v46 }
 0x141   : > { %v1245_v21 = vshrl.u32 %v2100_v56, %v1242_v38  ;;  %v1248_v0 = vshrl.u32 %v2101_v1, %v1242_v38  ;;  %v1251_v43 = vshrl.u32 %v2098_v3, %v1242_v38  ;;  %v1254_v19 = vshrl.u32 %v2102_v7, %v1242_v38 }
 0x142   : > { %v1066_v63 = vxor.u32 2147483648, %v1061_v10  ;;  %vm1068_vm6 = vcmp.eq.s32.totalorder %v2771_v36, 2  ;;  %v1174_v33 = vshll.u32 %v2788_v49, 30  ;;  %v1256_v47 = vshll.u32 %v2102_v7, %v1241_v57 }
 0x143   : > { %v2801_v35 = vshll.u32 %v1235_v53, 8  ;;  %v1246_v45 = vor.u32 %v1245_v21, %v1244_v32  ;;  %v2803_v27 = vor.u32 %v1248_v0, %v1247_v20  ;;  %v2805_v52 = vor.u32 %v1251_v43, %v1250_v2 }
 0x144   : > { %v757_v14 = vmul.f32 %v2400_v58, %v750_v25  ;;  %v2808_v9 = vsub.s32 %v1171_v8, %v1174_v33  ;;  %v1255_v37 = vor.u32 %v1254_v19, %v1253_v17  ;;  %v1257_v41 = vshrl.u32 %v2103_v28, %v1242_v38 }
 0x145   : > { %vm1259_vm7 = vcmp.lt.s32.totalorder %v2783_v30, 1  ;;  %v1067_v23 = vsel %vm1065_vm3, %v1053_v46, %v1066_v63  ;;  %v1070_v60 = vsel %vm1068_vm6, %v1069_v39, %v1061_v10  ;;  %vm1261_vm8 = vcmp.lt.s32.totalorder %v2783_v30, 3 }
 0x146   : > { %vm1176_vm9 = vcmp.lt.s32.totalorder %v2808_v9, 0  ;;  %v1177_v58 = vsub.s32 0, %v2808_v9  ;;  %v1258_v34 = vor.u32 %v1257_v41, %v1256_v47  ;;  %vm1262_vm10 = vcmp.lt.s32.totalorder %v2783_v30, 4 }
 0x147   : > { %vm1075_vm11 = vcmp.lt.s32.totalorder %v2562_v48, 0  ;;  %vm1260_vm12 = vcmp.lt.s32.totalorder %v2783_v30, 2  ;;  %v2825_v12 = vadd.f32 %v2411_v11, %v757_v14  ;;  %v1167_v62 = vadd.s32 %v2758_v44, %v2756_v61 }
 0x148   : > { %v1178_v55 = vsel %vm1176_vm9, %v1177_v58, %v2808_v9  ;;  %v1268_v59 = vsel %vm1262_vm10, %v1255_v37, 920167782  ;;  %v1271_v50 = vsel %vm1259_vm7, %v2803_v27, %v2805_v52  ;;  %v1071_v11 = vsel %vm1064_vm4, %v1067_v23, %v1070_v60 }
 0x149   : > { %v1179_v8 = vclz %v1178_v55  ;;  %v1269_v61 = vsel %vm1261_vm8, %v2805_v52, %v1268_v59  ;;  %v1272_v44 = vsel %vm1262_vm10, %v1258_v34, 1326507024  ;;  %v1276_v46 = vand.u32 65535, %v2801_v35 }
 0x14a   : > { %v1277_v10 = vshrl.u32 %v2801_v35, 16  ;;  %v1243_v13 = vshrl.u32 %v2099_v54, %v1242_v38  ;;  %v1384_v25 = vand.u32 2139095040, %v2825_v12  ;;  %v1072_v20 = vsel %vm1062_vm5, nan, %v1071_v11 }
 0x14b   : > { %v1867_v36 = vadd.s32 4294967294, %v1179_v8  ;;  %v1197_v2 = vsub.s32 4, %v2788_v49  ;;  %v1381_v41 = vand.u32 2147483647, %v2825_v12  ;;  %vm2876_vm14 = vcmp.le.f32.partialorder %v1073_v5, 0.7853982 }
 0x14c   : > { %vm1216_vm9 = vweird.f32 %v2562_v48 }
 0x14d   : > { %vm1868_vm13 = vcmp.lt.s32.totalorder %v1867_v36, 0 }
 0x14e   : > { %v1182_v38 = vsel %vm1868_vm13, 0, %v1867_v36 }
 0x14f   : > { %v1183_v14 = vsub.s32 32, %v1182_v38  ;;  %v1187_v31 = vsub.s32 4294967266, %v1182_v38 }
 0x150   : > { %v718_v29 = vpop.f32.mrf.mxu1 }
 0x151   : > { %v1535_v16 = vadd.f32 %v718_v29, %v2353_v6  ;;  %v1267_v6 = vsel %vm1259_vm7, %v1246_v45, %v2803_v27  ;;  %v1184_v29 = vshll.u32 %v2808_v9, %v1182_v38  ;;  %v1185_v23 = vshrl.u32 %v1167_v62, %v1183_v14 }
 0x152   : > { %v1270_v57 = vsel %vm1260_vm12, %v1267_v6, %v1269_v61  ;;  %v1188_v60 = vadd.s32 127, %v1187_v31  ;;  %v1264_v9 = vsel %vm1262_vm10, %v2805_v52, 2102212464 }
 0x153   : > { %v1540_v24 = vadd.f32 %v1535_v16, %v918_v4  ;;  %v1273_v4 = vsel %vm1261_vm8, %v1255_v37, %v1272_v44  ;;  %v1300_v63 = vand.u32 65535, %v1270_v57  ;;  %v1301_v39 = vshrl.u32 %v1270_v57, 16 }
 0x154   : > { %v1274_v53 = vsel %vm1260_vm12, %v1271_v50, %v1273_v4  ;;  %v2865_v37 = vsel %vm1075_vm11, %v1197_v2, %v2788_v49  ;;  %v1385_v16 = vshrl.u32 %v1384_v25, 23  ;;  %v1189_v59 = vshll.u32 %v1188_v60, 23 }
 0x155   : > { %1545 = vst [vmem:[%s2837_s24] sm:$0xff] %v1540_v24  ;;  %v1278_v21 = vand.u32 65535, %v1274_v53  ;;  %v1279_v0 = vshrl.u32 %v1274_v53, 16  ;;  %v1302_v6 = vmul.u32 %v1300_v63, %v1276_v46  ;;  %v1303_v55 = vmul.u32 %v1301_v39, %v1276_v46 }
 0x156   : > { %v1304_v11 = vmul.u32 %v1300_v63, %v1277_v10  ;;  %v1872_v61 = vadd.s32 4294967169, %v1385_v16  ;;  %v1190_v44 = vor.u32 4788187, %v1189_v59  ;;  %v1305_v4 = vmul.u32 %v1301_v39, %v1277_v10 }
 0x157   : > { %v1280_v43 = vmul.u32 %v1278_v21, %v1276_v46  ;;  %v1281_v19 = vmul.u32 %v1279_v0, %v1276_v46  ;;  %v1282_v33 = vmul.u32 %v1278_v21, %v1277_v10  ;;  %v1283_v58 = vmul.u32 %v1279_v0, %v1277_v10 }
 0x158   : > { %v721_v32 = vpop.f32.mrf.mxu1  ;;  %v1306_v8 = vshll.u32 %v1303_v55, 16  ;;  %v1265_v5 = vsel %vm1261_vm8, %v2803_v27, %v1264_v9  ;;  %v1308_v36 = vshll.u32 %v1304_v11, 16  ;;  %v1391_v21 = vadd.s32 1, %v1872_v61 }
 0x159   : > { %v1536_v17 = vadd.f32 %v721_v32, %v2365_v26  ;;  %v1263_v26 = vsel %vm1259_vm7, %v1243_v13, %v1246_v45  ;;  %v1284_v34 = vshll.u32 %v1281_v19, 16  ;;  %v1286_v24 = vshll.u32 %v1282_v33, 16 }
 0x15a   : > { %v1186_v45 = vor.u32 %v1185_v23, %v1184_v29  ;;  %v1285_v46 = vshrl.u32 %v1281_v19, 16  ;;  %v1191_v13 = vand.u32 2147483647, %v1190_v44  ;;  %vm1310_vm1 = vc.u32 %v1302_v6, %v1306_v8 }
 0x15b   : > { %v1541_v47 = vadd.f32 %v1536_v17, %v1072_v20  ;;  %vm1288_vm15 = vc.u32 %v1280_v43, %v1284_v34  ;;  %v1290_v62 = vadd.s32 %v1284_v34, %v1280_v43  ;;  %v1312_v25 = vadd.s32 %v1306_v8, %v1302_v6 }
 0x15c   : > { %v1289_v50 = vsel %vm1288_vm15, 1, %v2104_v18  ;;  %v1193_v52 = vcvt.s32.f32 %v1186_v45  ;;  %v1287_v32 = vshrl.u32 %v1282_v33, 16  ;;  %v1311_v2 = vsel %vm1310_vm1, 1, %v2104_v18 }
 0x15d   : > { %1546 = vst [vmem:[%s2837_s24 + $0x8] sm:$0xff] %v1541_v47  ;;  %v1291_v57 = vadd.s32 %v1289_v50, %v1283_v58  ;;  %vm1292_vm0 = vc.u32 %v1290_v62, %v1286_v24  ;;  %v1307_v17 = vshrl.u32 %v1303_v55, 16  ;;  %v1313_v10 = vadd.s32 %v1311_v2, %v1305_v4 }
 0x15e   : > { %v1293_v53 = vsel %vm1292_vm0, 1, %v2104_v18  ;;  %v1194_v0 = vmul.f32 %v1193_v52, %v1191_v13  ;;  %vm1314_vm2 = vc.u32 %v1312_v25, %v1308_v36  ;;  %v1266_v27 = vsel %vm1260_vm12, %v1263_v26, %v1265_v5 }
 0x15f   : > { %v1295_v20 = vadd.s32 %v1293_v53, %v1291_v57  ;;  %v1315_v39 = vsel %vm1314_vm2, 1, %v2104_v18  ;;  %vm1392_vm3 = vcmp.gt.s32.totalorder %v1391_v21, 0  ;;  %v1309_v43 = vshrl.u32 %v1304_v11, 16 }
 0x160   : > { %v1195_v38 = vxor.u32 2147483648, %v1194_v0  ;;  %v1317_v19 = vadd.s32 %v1315_v39, %v1313_v10  ;;  %v1393_v47 = vsel %vm1392_vm3, %v1391_v21, 0  ;;  %v2891_v14 = vadd.s32 %v1312_v25, %v1308_v36 }
 0x161   : > { %v1296_v63 = vadd.s32 %v1295_v20, %v1285_v46  ;;  %v1395_v29 = vand.u32 31, %v1393_v47  ;;  %v1200_v30 = vsel %vm2876_vm14, 0, %v2865_v37  ;;  %v1388_v16 = vand.u32 8388607, %v1381_v41 }
 0x162   : > { %v1196_v31 = vsel %vm1075_vm11, %v1195_v38, %v1194_v0  ;;  %v1318_v26 = vadd.s32 %v1317_v19, %v1307_v17  ;;  %v1320_v60 = vmul.u32 %v2801_v35, %v1266_v27  ;;  %v2904_v58 = vshrl.u32 %v1393_v47, 5 }
 0x163   : > { %v2889_v33 = vadd.s32 %v1296_v63, %v1287_v32  ;;  %v1199_v23 = vsel %vm2876_vm14, %v2562_v48, %v1196_v31  ;;  %v2906_v34 = vsub.s32 32, %v1395_v29  ;;  %v1398_v6 = vshll.u32 %v2099_v54, %v1395_v29 }
 0x164   : > { %v1201_v9 = vmul.f32 %v1199_v23, %v1199_v23  ;;  %v1319_v24 = vadd.s32 %v1318_v26, %v1309_v43  ;;  %v1401_v37 = vshll.u32 %v2100_v56, %v1395_v29  ;;  %v1404_v35 = vshll.u32 %v2101_v1, %v1395_v29 }
 0x165   : > { %vm1322_vm4 = vc.u32 %v2889_v33, %v2891_v14  ;;  %v1399_v55 = vshrl.u32 %v2100_v56, %v2906_v34  ;;  %v1402_v49 = vshrl.u32 %v2101_v1, %v2906_v34  ;;  %v1405_v50 = vshrl.u32 %v2098_v3, %v2906_v34 }
 0x166   : > { %v1202_v45 = vmul.f32 -0.001358992, %v1201_v9  ;;  %v1209_v59 = vmul.f32 -0.00019511016, %v1201_v9  ;;  %v1323_v62 = vadd.s32 1, %v1319_v24  ;;  %v1389_v11 = vor.u32 8388608, %v1388_v16  ;;  %v724_v16 = vpop.f32.mrf.mxu1 }
 0x167   : > { %v2919_v8 = vor.u32 %v1399_v55, %v1398_v6  ;;  %v1407_v61 = vshll.u32 %v2098_v3, %v1395_v29  ;;  %v1408_v44 = vshrl.u32 %v2102_v7, %v2906_v34  ;;  %v2924_v4 = vor.u32 %v1402_v49, %v1401_v37 }
 0x168   : > { %v1203_v56 = vadd.f32 0.041655596, %v1202_v45  ;;  %v1210_v52 = vadd.f32 0.008332121, %v1209_v59  ;;  %v1324_v57 = vsel %vm1322_vm4, %v1323_v62, %v1319_v24  ;;  %v1410_v46 = vshll.u32 %v2102_v7, %v1395_v29 }
 0x169   : > { %v1325_v1 = vadd.s32 %v1324_v57, %v1320_v60  ;;  %v1409_v5 = vor.u32 %v1408_v44, %v1407_v61  ;;  %v1411_v36 = vshrl.u32 %v2103_v28, %v2906_v34  ;;  %v2929_v25 = vor.u32 %v1405_v50, %v1404_v35 }
 0x16a   : > { %v1204_v13 = vmul.f32 %v1203_v56, %v1201_v9  ;;  %v1211_v53 = vmul.f32 %v1210_v52, %v1201_v9  ;;  %vm1413_vm5 = vcmp.lt.s32.totalorder %v2904_v58, 1  ;;  %v1217_v3 = vand.u32 3, %v1200_v30 }
 0x16b   : > { %v1326_v32 = vadd.s32 536870912, %v1325_v1  ;;  %vm1415_vm6 = vcmp.lt.s32.totalorder %v2904_v58, 3  ;;  %vm1416_vm7 = vcmp.lt.s32.totalorder %v2904_v58, 4  ;;  %v1412_v21 = vor.u32 %v1411_v36, %v1410_v46 }
 0x16c   : > { %v1205_v20 = vadd.f32 -0.4999988, %v1204_v13  ;;  %v1212_v2 = vadd.f32 -0.16666654, %v1211_v53  ;;  %vm1414_vm8 = vcmp.lt.s32.totalorder %v2904_v58, 2  ;;  %v1421_v7 = vsel %vm1413_vm5, %v2919_v8, %v2924_v4 }
 0x16d   : > { %v2934_v0 = vshrl.u32 %v1326_v32, 30  ;;  %v1422_v28 = vsel %vm1416_vm7, %v1409_v5, 920167782  ;;  %v2946_v63 = vshll.u32 %v1389_v11, 8  ;;  %vm1219_vm10 = vcmp.eq.s32.totalorder %v1217_v3, 0 }
 0x16e   : > { %v1206_v17 = vmul.f32 %v1205_v20, %v1201_v9  ;;  %v1213_v10 = vmul.f32 %v1212_v2, %v1201_v9  ;;  %v1423_v27 = vsel %vm1415_vm6, %v2929_v25, %v1422_v28  ;;  %v1425_v38 = vsel %vm1413_vm5, %v2924_v4, %v2929_v25 }
 0x16f   : > { %v1328_v39 = vshll.u32 %v2934_v0, 30  ;;  %v1424_v47 = vsel %vm1414_vm8, %v1421_v7, %v1423_v27  ;;  %v1426_v29 = vsel %vm1416_vm7, %v1412_v21, 1326507024  ;;  %vm1222_vm11 = vcmp.eq.s32.totalorder %v1217_v3, 2 }
 0x170   : > { %v1207_v43 = vadd.f32 1.0, %v1206_v17  ;;  %v1214_v19 = vadd.f32 1.0, %v1213_v10  ;;  %v1427_v30 = vsel %vm1415_vm6, %v1409_v5, %v1426_v29  ;;  %v1431_v26 = vshrl.u32 %v2946_v63, 16 }
 0x171   : > { %v1329_v31 = vsub.s32 %v1325_v1, %v1328_v39  ;;  %v1428_v24 = vsel %vm1414_vm8, %v1425_v38, %v1427_v30  ;;  %v1430_v6 = vand.u32 65535, %v2946_v63  ;;  %v1455_v49 = vshrl.u32 %v1424_v47, 16 }
 0x172   : > { %v1215_v60 = vmul.f32 %v1214_v19, %v1199_v23  ;;  %v1223_v9 = vxor.u32 2147483648, %v1207_v43  ;;  %v1432_v55 = vand.u32 65535, %v1428_v24  ;;  %vm1218_vm13 = vcmp.lt.s32.totalorder %v1217_v3, 2 }
 0x173   : > { %vm1330_vm12 = vcmp.lt.s32.totalorder %v1329_v31, 0  ;;  %v1331_v37 = vsub.s32 0, %v1329_v31  ;;  %v1433_v59 = vshrl.u32 %v1428_v24, 16  ;;  %v1537_v62 = vadd.f32 %v724_v16, %v2377_v51 }
 0x174   : > { %v1220_v35 = vxor.u32 2147483648, %v1215_v60  ;;  %v1224_v45 = vsel %vm1222_vm11, %v1223_v9, %v1215_v60  ;;  %v1436_v11 = vmul.u32 %v1432_v55, %v1431_v26  ;;  %v1454_v61 = vand.u32 65535, %v1424_v47 }
 0x175   : > { %v1332_v50 = vsel %vm1330_vm12, %v1331_v37, %v1329_v31  ;;  %v1434_v56 = vmul.u32 %v1432_v55, %v1430_v6  ;;  %v1435_v52 = vmul.u32 %v1433_v59, %v1430_v6  ;;  %v1457_v1 = vmul.u32 %v1455_v49, %v1430_v6 }
 0x176   : > { %v1221_v23 = vsel %vm1219_vm10, %v1207_v43, %v1220_v35  ;;  %v1333_v44 = vclz %v1332_v50  ;;  %v1321_v51 = vadd.s32 %v2891_v14, %v2889_v33  ;;  %v1437_v53 = vmul.u32 %v1433_v59, %v1431_v26 }
 0x177   : > { %v1225_v57 = vsel %vm1218_vm13, %v1221_v23, %v1224_v45  ;;  %v1438_v36 = vshll.u32 %v1435_v52, 16  ;;  %v1440_v32 = vshll.u32 %v1436_v11, 16  ;;  %v1456_v3 = vmul.u32 %v1454_v61, %v1430_v6 }
 0x178   : > { %v1226_v5 = vsel %vm1216_vm9, nan, %v1225_v57  ;;  %v1870_v46 = vadd.s32 4294967294, %v1333_v44  ;;  %v1458_v20 = vmul.u32 %v1454_v61, %v1431_v26  ;;  %v1460_v28 = vshll.u32 %v1457_v1, 16 }
 0x179   : > { %v1542_v13 = vadd.f32 %v1537_v62, %v1226_v5  ;;  %vm1442_vm15 = vc.u32 %v1434_v56, %v1438_v36  ;;  %v1444_v7 = vadd.s32 %v1438_v36, %v1434_v56  ;;  %v1439_v27 = vshrl.u32 %v1435_v52, 16 }
 0x17a   : > { %vm1871_vm14 = vcmp.lt.s32.totalorder %v1870_v46, 0  ;;  %v1443_v21 = vsel %vm1442_vm15, 1, %v2104_v18  ;;  %v1459_v38 = vmul.u32 %v1455_v49, %v1431_v26  ;;  %v1462_v19 = vshll.u32 %v1458_v20, 16 }
 0x17b   : > { %1547 = vst [vmem:[%s2837_s24 + $0x10] sm:$0xff] %v1542_v13  ;;  %v1336_v2 = vsel %vm1871_vm14, 0, %v1870_v46  ;;  %v1445_v39 = vadd.s32 %v1443_v21, %v1437_v53  ;;  %vm1446_vm0 = vc.u32 %v1444_v7, %v1440_v32  ;;  %v1397_v47 = vshrl.u32 %v2099_v54, %v2906_v34 }
 0x17c   : > { %v1337_v48 = vsub.s32 32, %v1336_v2  ;;  %v1338_v17 = vshll.u32 %v1329_v31, %v1336_v2  ;;  %v1341_v10 = vsub.s32 4294967266, %v1336_v2  ;;  %v1447_v43 = vsel %vm1446_vm0, 1, %v2104_v18 }
 0x17d   : > { %v1418_v29 = vsel %vm1416_vm7, %v2929_v25, 2102212464  ;;  %v1449_v30 = vadd.s32 %v1447_v43, %v1445_v39  ;;  %vm1464_vm1 = vc.u32 %v1456_v3, %v1460_v28  ;;  %v1466_v9 = vadd.s32 %v1460_v28, %v1456_v3 }
 0x17e   : > { %v1339_v33 = vshrl.u32 %v1321_v51, %v1337_v48  ;;  %v1342_v14 = vadd.s32 127, %v1341_v10  ;;  %v1465_v60 = vsel %vm1464_vm1, 1, %v2104_v18  ;;  %v1441_v26 = vshrl.u32 %v1436_v11, 16 }
 0x17f   : > { %v1450_v24 = vadd.s32 %v1449_v30, %v1439_v27  ;;  %v1467_v6 = vadd.s32 %v1465_v60, %v1459_v38  ;;  %v1461_v49 = vshrl.u32 %v1457_v1, 16  ;;  %vm1468_vm2 = vc.u32 %v1466_v9, %v1462_v19 }
 0x180   : > { %v1340_v31 = vor.u32 %v1339_v33, %v1338_v17  ;;  %v1343_v16 = vshll.u32 %v1342_v14, 23  ;;  %v1417_v54 = vsel %vm1413_vm5, %v1397_v47, %v2919_v8  ;;  %v1419_v34 = vsel %vm1415_vm6, %v2924_v4, %v1418_v29  ;;  %v727_v14 = vpop.f32.mrf.mxu1 }
 0x181   : > { %v1469_v25 = vsel %vm1468_vm2, 1, %v2104_v18  ;;  %v1463_v45 = vshrl.u32 %v1458_v20, 16  ;;  %v1451_v62 = vadd.s32 %v1450_v24, %v1441_v26  ;;  %v1470_v50 = vadd.s32 %v1466_v9, %v1462_v19 }
 0x182   : > { %v1344_v37 = vor.u32 4788187, %v1343_v16  ;;  %v1347_v55 = vcvt.s32.f32 %v1340_v31  ;;  %v1471_v59 = vadd.s32 %v1469_v25, %v1467_v6  ;;  %v1420_v61 = vsel %vm1414_vm8, %v1417_v54, %v1419_v34 }
 0x183   : > { %vm1229_vm3 = vcmp.lt.s32.totalorder %v2735_v15, 0  ;;  %vm2991_vm4 = vcmp.le.f32.partialorder %v1227_v40, 0.7853982  ;;  %v1474_v44 = vmul.u32 %v2946_v63, %v1420_v61  ;;  %vm1476_vm5 = vc.u32 %v1451_v62, %v1470_v50 }
 0x184   : > { %v1345_v35 = vand.u32 2147483647, %v1344_v37  ;;  %v1472_v23 = vadd.s32 %v1471_v59, %v1461_v49  ;;  %v1351_v57 = vsub.s32 4, %v2934_v0  ;;  %vm1370_vm10 = vweird.f32 %v2735_v15 }
 0x185   : > { %v1538_v16 = vadd.f32 %v727_v14, %v2391_v42  ;;  %v1475_v9 = vadd.s32 %v1470_v50, %v1451_v62  ;;  %vm1383_vm12 = vcmp.lt.s32.totalorder %v2825_v12, 0  ;;  %vm3009_vm13 = vcmp.le.f32.partialorder %v1381_v41, 0.7853982 }
 0x186   : > { %v1348_v11 = vmul.f32 %v1347_v55, %v1345_v35  ;;  %v1473_v18 = vadd.s32 %v1472_v23, %v1463_v45  ;;  %v1352_v13 = vsel %vm1229_vm3, %v1351_v57, %v2934_v0  ;;  %vm1524_vm1 = vweird.f32 %v2825_v12 }
 0x187   : > { %v1354_v3 = vsel %vm2991_vm4, 0, %v1352_v13 }
 0x188   : > { %v1349_v4 = vxor.u32 2147483648, %v1348_v11  ;;  %v1477_v52 = vadd.s32 1, %v1473_v18  ;;  %v1371_v48 = vand.u32 3, %v1354_v3 }
 0x18a   : > { %v1350_v56 = vsel %vm1229_vm3, %v1349_v4, %v1348_v11  ;;  %v1478_v5 = vsel %vm1476_vm5, %v1477_v52, %v1473_v18  ;;  %vm1376_vm7 = vcmp.eq.s32.totalorder %v1371_v48, 2  ;;  %vm1373_vm8 = vcmp.eq.s32.totalorder %v1371_v48, 0 }
 0x18b   : > { %v1353_v58 = vsel %vm2991_vm4, %v2735_v15, %v1350_v56  ;;  %v1479_v46 = vadd.s32 %v1478_v5, %v1474_v44  ;;  %vm1372_vm9 = vcmp.lt.s32.totalorder %v1371_v48, 2 }
 0x18c   : > { %v1355_v1 = vmul.f32 %v1353_v58, %v1353_v58 }
 0x18d   : > { %v1480_v51 = vadd.s32 536870912, %v1479_v46 }
 0x18e   : > { %v1356_v40 = vmul.f32 -0.001358992, %v1355_v1  ;;  %v1363_v36 = vmul.f32 -0.00019511016, %v1355_v1 }
 0x18f   : > { %v1481_v63 = vshrl.u32 %v1480_v51, 30 }
 0x190   : > { %v1357_v53 = vadd.f32 0.041655596, %v1356_v40  ;;  %v1364_v32 = vadd.f32 0.008332121, %v1363_v36 }
 0x191   : > { %v1482_v21 = vshll.u32 %v1481_v63, 30  ;;  %v1505_v23 = vsub.s32 4, %v1481_v63 }
 0x192   : > { %v1358_v20 = vmul.f32 %v1357_v53, %v1355_v1  ;;  %v1365_v2 = vmul.f32 %v1364_v32, %v1355_v1  ;;  %v730_v32 = vpop.f32.mrf.mxu1 }
 0x193   : > { %v1483_v17 = vsub.s32 %v1479_v46, %v1482_v21  ;;  %v1506_v56 = vsel %vm1383_vm12, %v1505_v23, %v1481_v63  ;;  %v1539_v21 = vadd.f32 %v730_v32, %v2602_v22 }
 0x194   : > { %v1359_v7 = vadd.f32 -0.4999988, %v1358_v20  ;;  %v1366_v28 = vadd.f32 -0.16666654, %v1365_v2 }
 0x195   : > { %vm1484_vm6 = vcmp.lt.s32.totalorder %v1483_v17, 0  ;;  %v1485_v39 = vsub.s32 0, %v1483_v17 }
 0x196   : > { %v1360_v10 = vmul.f32 %v1359_v7, %v1355_v1  ;;  %v1367_v27 = vmul.f32 %v1366_v28, %v1355_v1 }
 0x197   : > { %v1486_v33 = vsel %vm1484_vm6, %v1485_v39, %v1483_v17 }
 0x198   : > { %v1361_v38 = vadd.f32 1.0, %v1360_v10  ;;  %v1368_v0 = vadd.f32 1.0, %v1367_v27  ;;  %v1487_v47 = vclz %v1486_v33 }
 0x19a   : > { %v1369_v43 = vmul.f32 %v1368_v0, %v1353_v58  ;;  %v1377_v19 = vxor.u32 2147483648, %v1361_v38  ;;  %v1873_v31 = vadd.s32 4294967294, %v1487_v47  ;;  %v1508_v58 = vsel %vm3009_vm13, 0, %v1506_v56 }
 0x19b   : > { %v1525_v40 = vand.u32 3, %v1508_v58 }
 0x19c   : > { %v1374_v29 = vxor.u32 2147483648, %v1369_v43  ;;  %v1378_v30 = vsel %vm1376_vm7, %v1377_v19, %v1369_v43  ;;  %vm1874_vm11 = vcmp.lt.s32.totalorder %v1873_v31, 0 }
 0x19d   : > { %v1490_v24 = vsel %vm1874_vm11, 0, %v1873_v31  ;;  %vm1530_vm14 = vcmp.eq.s32.totalorder %v1525_v40, 2  ;;  %vm1527_vm15 = vcmp.eq.s32.totalorder %v1525_v40, 0  ;;  %vm1526_vm0 = vcmp.lt.s32.totalorder %v1525_v40, 2 }
 0x19e   : > { %v1375_v60 = vsel %vm1373_vm8, %v1361_v38, %v1374_v29  ;;  %v1491_v37 = vsub.s32 32, %v1490_v24  ;;  %v1492_v55 = vshll.u32 %v1483_v17, %v1490_v24  ;;  %v1495_v49 = vsub.s32 4294967266, %v1490_v24 }
 0x19f   : > { %v1379_v26 = vsel %vm1372_vm9, %v1375_v60, %v1378_v30 }
 0x1a0   : > { %v1380_v6 = vsel %vm1370_vm10, nan, %v1379_v26  ;;  %v1493_v34 = vshrl.u32 %v1475_v9, %v1491_v37  ;;  %v1496_v25 = vadd.s32 127, %v1495_v49 }
 0x1a1   : > { %v1543_v54 = vadd.f32 %v1538_v16, %v1380_v6 }
 0x1a2   : > { %v1494_v35 = vor.u32 %v1493_v34, %v1492_v55  ;;  %v1497_v45 = vshll.u32 %v1496_v25, 23 }
 0x1a3   : > { %1548 = vst [vmem:[%s2837_s24 + $0x18] sm:$0xff] %v1543_v54 }
 0x1a4   : > { %v1498_v59 = vor.u32 4788187, %v1497_v45  ;;  %v1501_v11 = vcvt.s32.f32 %v1494_v35 }
 0x1a6   : > { %v1499_v15 = vand.u32 2147483647, %v1498_v59 }
 0x1a8   : > { %v1502_v61 = vmul.f32 %v1501_v11, %v1499_v15 }
 0x1aa   : > { %v1503_v62 = vxor.u32 2147483648, %v1502_v61 }
 0x1ac   : > { %v1504_v50 = vsel %vm1383_vm12, %v1503_v62, %v1502_v61 }
 0x1ad   : > { %v1507_v8 = vsel %vm3009_vm13, %v2825_v12, %v1504_v50 }
 0x1ae   : > { %v1509_v4 = vmul.f32 %v1507_v8, %v1507_v8 }
 0x1b0   : > { %v1510_v18 = vmul.f32 -0.001358992, %v1509_v4  ;;  %v1517_v44 = vmul.f32 -0.00019511016, %v1509_v4 }
 0x1b2   : > { %v1511_v52 = vadd.f32 0.041655596, %v1510_v18  ;;  %v1518_v57 = vadd.f32 0.008332121, %v1517_v44 }
 0x1b4   : > { %v1512_v41 = vmul.f32 %v1511_v52, %v1509_v4  ;;  %v1519_v1 = vmul.f32 %v1518_v57, %v1509_v4 }
 0x1b6   : > { %v1513_v5 = vadd.f32 -0.4999988, %v1512_v41  ;;  %v1520_v46 = vadd.f32 -0.16666654, %v1519_v1 }
 0x1b8   : > { %v1514_v36 = vmul.f32 %v1513_v5, %v1509_v4  ;;  %v1521_v13 = vmul.f32 %v1520_v46, %v1509_v4 }
 0x1ba   : > { %v1515_v51 = vadd.f32 1.0, %v1514_v36  ;;  %v1522_v53 = vadd.f32 1.0, %v1521_v13 }
 0x1bc   : > { %v1523_v3 = vmul.f32 %v1522_v53, %v1507_v8  ;;  %v1531_v20 = vxor.u32 2147483648, %v1515_v51 }
 0x1be   : > { %v1528_v63 = vxor.u32 2147483648, %v1523_v3  ;;  %v1532_v2 = vsel %vm1530_vm14, %v1531_v20, %v1523_v3 }
 0x1c0   : > { %v1529_v7 = vsel %vm1527_vm15, %v1515_v51, %v1528_v63 }
 0x1c1   : > { %v1533_v28 = vsel %vm1526_vm0, %v1529_v7, %v1532_v2  ;;  %1556 = sbr.rel (!%p2173_p4) target bundleno = 508 (0x1fc), region = 48 }
 0x1c2   : > { %v1534_v48 = vsel %vm1524_vm1, nan, %v1533_v28 }
 0x1c3   : > { %v1544_v17 = vadd.f32 %v1539_v21, %v1534_v48 }
 0x1c5   : > { %1549 = vst [vmem:[%s2837_s24 + $0x20] sm:$0xff] %v1544_v17 }
 0x1c6   : > { %s3107_s25 = smov (!%p1559_p8, %s1558_s25), 5 }
 0x1c7   : > { %s1875_s12 = sshll.u32 %s3107_s25, 3 }
 0x1c8   : > { %p1878_p9 = scmp.eq.s32.totalorder %s1875_s12, 0 }
 0x1c9   : > { %2003 = sdivrem.u32 (!%p1878_p9), %s3107_s25, 5 }
 0x1ca   : > { %1567 = sbr.rel (%p1878_p9) target bundleno = 508 (0x1fc), region = 52 }
 0x1d2   : > { %s3034_s10 = spop.drf %2003 }
 0x1d3   : > { %s2005_s13 = spop.drf %2003  ;;  %p1879_p10 = scmp.le.s32.totalorder %s3034_s10, 0 }
 0x1d4   : > { %s3100_s0 = smov (!%p1879_p10), %s3028_s11  ;;  %s3101_s19 = smov (!%p1879_p10), %s2837_s24 }
 0x1d5   : > { %1740 = sbr.rel (%p1879_p10) target bundleno = 482 (0x1e2), region = 128  ;;  %s3043_s14 = smov (!%p1879_p10), 0  }
 0x1d6   : > { %s3045_s15 = smov (!%p1879_p10), 0  }
 0x1da LB: >> { %v1640_v22 = vld [vmem:[%s2071_s19] sm:$0xff]  ;;  %v1642_v12 = vld [vmem:[%s2071_s19 + $0x8] sm:$0xff]  ;;  %v1644_v10 = vld [vmem:[%s2071_s19 + $0x10] sm:$0xff]  ;;  %s1650_s16 = sadd.s32 1, %s2075_s14  ;;  %s1634_s15 = sadd.s32 1, %s2079_s15   ;;  %s2079_s15 = sphi %s3045_s15, %s1634_s15   ;;  %s2075_s14 = sphi %s3043_s14, %s3102_s14   ;;  %s2071_s19 = sphi %s3101_s19, %s1655_s19   ;;  %s2067_s0 = sphi %s3100_s0, %s1656_s0  }
 0x1db   : >> { %1641 = vst [vmem:[%s2067_s0] sm:$0xff] %v1640_v22  ;;  %v1646_v27 = vld [vmem:[%s2071_s19 + $0x18] sm:$0xff]  ;;  %p1651_p11 = scmp.ge.s32.totalorder %s1650_s16, %s3034_s10  ;;  %v1648_v39 = vld [vmem:[%s2071_s19 + $0x20] sm:$0xff]  ;;  %p1633_p12 = scmp.ge.s32.totalorder %s1634_s15, %s3034_s10 }
 0x1dc   : >> { %1643 = vst [vmem:[%s2067_s0 + $0x8] sm:$0xff] %v1642_v12 }
 0x1dd   : >> { %1645 = vst [vmem:[%s2067_s0 + $0x10] sm:$0xff] %v1644_v10  ;;  %s3109_s16 = smov (%p1651_p11, %s1650_s16), 0  ;;  %1636 = sbr.rel (!%p1633_p12) target bundleno = 474 (0x1da), region = 134 }
 0x1de   : >> { %1647 = vst [vmem:[%s2067_s0 + $0x18] sm:$0xff] %v1646_v27  ;;  %s1653_s17 = smul.u32 40, %s3109_s16  ;;  %s3102_s14 = smov %s3109_s16 }
 0x1df   : >> { %1649 = vst [vmem:[%s2067_s0 + $0x20] sm:$0xff] %v1648_v39 }
 0x1e0   : >> { %s1655_s19 = scalar_lea.vmem %s2837_s24, %s1653_s17 [#allocation4]   ;;  %s1656_s0 = scalar_lea.vmem %s3028_s11, %s1653_s17  }
 0x1e2 PF: > { %2006 = sdivrem.u32 %s3107_s25, 5 }
 0x1e3   : > { %s1880_s18 = smul.u32 40, %s3034_s10 }
 0x1e5   : > { %s3066_s20 = scalar_lea.vmem %s2837_s24, %s1880_s18 [#allocation4]   ;;  %s1663_s21 = scalar_lea.vmem %s3028_s11, %s1880_s18  }
 0x1eb   : > { %s2007_s22 = spop.drf %2006 }
 0x1ec   : > { %s2008_s23 = spop.drf %2006 }
 0x1ed   : > { %p1882_p13 = scmp.le.s32.totalorder %s2008_s23, 0 }
 0x1ee   : > { %s2081_s26 = smov (!%p1882_p13), %s1663_s21   ;;  %s2085_s28 = smov (!%p1882_p13), %s3066_s20  }
 0x1ef   : > { %1754 = sbr.rel (%p1882_p13) target bundleno = 508 (0x1fc), region = 139  ;;  %s2089_s30 = smov (!%p1882_p13), 0  }
 0x1f0   : > { %s2093_s8 = smov (!%p1882_p13), 0  }
 0x1f4 LB: >> { %v1673_v38 = vld [vmem:[%s2087_s28] sm:$0xff]  ;;  %s1675_s24 = sadd.s32 1, %s2091_s30  ;;  %s1667_s8 = sadd.s32 1, %s2095_s8   ;;  %s2095_s8 = sphi %s2093_s8, %s1667_s8   ;;  %s2091_s30 = sphi %s2089_s30, %s2090_s30   ;;  %s2087_s28 = sphi %s2085_s28, %s1680_s28   ;;  %s2083_s26 = sphi %s2081_s26, %s1681_s26  }
 0x1f5   : >> { %1674 = vst [vmem:[%s2083_s26] sm:$0xff] %v1673_v38  ;;  %p1676_p0 = scmp.ge.s32.totalorder %s1675_s24, %s2008_s23  ;;  %p1666_p1 = scmp.ge.s32.totalorder %s1667_s8, %s2008_s23 }
 0x1f7   : >> { %s3111_s24 = smov (%p1676_p0, %s1675_s24), 0  ;;  %1669 = sbr.rel (!%p1666_p1) target bundleno = 500 (0x1f4), region = 145 }
 0x1f8   : >> { %s1883_s25 = sshll.u32 %s3111_s24, 3  ;;  %s2090_s30 = smov %s3111_s24  }
 0x1f9   : >> { %s1680_s28 = scalar_lea.vmem %s3066_s20, %s1883_s25 [#allocation4]   ;;  %s1681_s26 = scalar_lea.vmem %s1663_s21, %s1883_s25  }
 0x1fc PF: > { %p15_p2 = scmp.ge.s32.totalorder %s2163_s29, 4   ;;  %s3103_s26 = smov %s2059_s27 }
 0x1fd   : > { %s3104_s27 = smov %s2171_s9  ;;  %s3105_s28 = smov %s2163_s29 }
 0x1fe   :  { %17 = sbr.rel (!%p15_p2) target bundleno = 4 (0x4), region = 156 }

</bundles_post_ra>
